<compile_context>
chip_gen: v7x
topology: tpu7x:2x2x1
jax: 0.10.0
libtpu: 0.0.40
codegen_flags: <defaults>
</compile_context>

<pallas_src>
import jax
import jax.numpy as jnp
from jax.experimental import pallas as pl
from jax.experimental.pallas import tpu as pltpu


def _round_up(x, m):
    return ((x + m - 1) // m) * m


def _vmem_capacity_bytes():
    """Chip-aware VMEM capacity (falls back to the v7x 64 MiB if unknown)."""
    try:
        return int(pltpu.get_tpu_info().vmem_capacity_bytes)
    except Exception:
        return 64 * 1024 * 1024


def _pick_batch_block(B, Nq, *, target_rows, max_rows=2048, min_steps=2):
    """Batch fold Bb (divisor of B) such that the grid keeps >= min_steps
    steps (both v7x TensorCores busy) and packed rows Bb*Nq reach target_rows
    when possible, otherwise stay <= max_rows."""
    max_bb = B if B < min_steps else B // min_steps
    divisors = [d for d in range(1, max_bb + 1) if B % d == 0]
    if not divisors:
        return 1
    for d in divisors:
        if d * Nq >= target_rows:
            return d
    best = 1
    for d in divisors:
        if d * Nq <= max_rows:
            best = d
    return best


def _make_kernel(*, heads, dp, Bb, Nq, Nk, qd_p, use_bf16):
    inner_p = heads * dp

    def kernel(q_ref, k_ref, v_ref, wq_ref, wk_ref, wv_ref, wo_ref, bo_ref,
               o_ref):
        cast = (lambda t: t.astype(jnp.bfloat16)) if use_bf16 else (lambda t: t)
        kvd_p = k_ref.shape[-1]

        # ---- Packed projections: one tall 2-D matmul each (M = Bb*N). ------
        q2 = q_ref[...].reshape(Bb * Nq, qd_p)
        k2 = k_ref[...].reshape(Bb * Nk, kvd_p)
        v2 = v_ref[...].reshape(Bb * Nk, kvd_p)

        # Weights arrive pre-cast (bf16) from the wrapper; scale is folded
        # into Wq.  f32 accumulation on the MXU.
        Q = jnp.dot(cast(q2), wq_ref[...], preferred_element_type=jnp.float32)
        K = jnp.dot(cast(k2), wk_ref[...], preferred_element_type=jnp.float32)
        V = jnp.dot(cast(v2), wv_ref[...], preferred_element_type=jnp.float32)

        # Cast once (not per head) for the attention-core MXU operands.
        Qc = cast(Q).reshape(Bb, Nq, inner_p)
        Kc = cast(K).reshape(Bb, Nk, inner_p)
        Vc = cast(V).reshape(Bb, Nk, inner_p)

        # ---- Attention + fused head-merge/output-projection. ---------------
        # dim_head is padded to dp (multiple of 128) by the wrapper, so every
        # lane slice below is (8,128)-tile aligned: no relayout, no masked
        # loads, and no lane-partial scratch stores (the head merge is folded
        # into the per-head output-projection accumulation).
        acc = jnp.zeros((Bb * Nq, qd_p), jnp.float32)
        for h in range(heads):
            lo = h * dp
            hi = lo + dp
            Qh = Qc[:, :, lo:hi]                                 # (Bb, Nq, dp)
            Kh = Kc[:, :, lo:hi]                                 # (Bb, Nk, dp)
            Vh = Vc[:, :, lo:hi]                                 # (Bb, Nk, dp)

            # Scores: contract d directly (no explicit K^T / XLU transpose).
            dots = jnp.einsum('bqd,bkd->bqk', Qh, Kh,
                              preferred_element_type=jnp.float32)

            # Numerically-stable softmax in f32, normalization deferred.
            m = jnp.max(dots, axis=-1, keepdims=True)
            p = jnp.exp(dots - m)
            denom = jnp.sum(p, axis=-1, keepdims=True)

            oh = jnp.einsum('bqk,bkd->bqd', cast(p), Vh,
                            preferred_element_type=jnp.float32)  # (Bb, Nq, dp)
            # Normalize the small (Nq, dp) context; approx recip rides the EUP.
            oh = oh * pl.reciprocal(denom, approx=True)

            # Fused head merge + output projection: Wo rows for this head are
            # a 128-aligned sublane slice of the resident weight block.
            acc = acc + jnp.dot(cast(oh.reshape(Bb * Nq, dp)),
                                wo_ref[lo:hi, :],
                                preferred_element_type=jnp.float32)

        out = acc + bo_ref[...]                                  # (1, qd_p) bcast
        o_ref[...] = out.reshape(Bb, Nq, qd_p).astype(o_ref.dtype)

    return kernel


def attention_forward(q, k, v, params, *, heads, dim_head,
                      use_bf16_matmul=True, unpad_output=True):
    """q: (B, Nq, q_dim); k, v: (B, Nk, kv_dim). Returns (B, Nq, q_dim)
    (or (B, Nq, round_up(q_dim, 128)) if unpad_output=False)."""
    B, Nq, q_dim = q.shape
    Bk, Nk, kv_dim = k.shape
    assert Bk == B and v.shape == (B, Nk, kv_dim)
    inner_dim = heads * dim_head
    scale = dim_head ** (-0.5)

    wq, wk, wv, wo, bo = params
    assert wq.shape == (q_dim, inner_dim)
    assert wk.shape == (kv_dim, inner_dim)
    assert wv.shape == (kv_dim, inner_dim)
    assert wo.shape == (inner_dim, q_dim)

    # Packed (Bb*N, D) views assume sublane-aligned sequence lengths.
    assert Nq % 8 == 0 and Nk % 8 == 0, "Nq/Nk must be multiples of 8"

    # ---- Lane-dense padding: feature dims and per-head dim to 128. ---------
    qd_p = _round_up(q_dim, 128)
    kvd_p = _round_up(kv_dim, 128)
    dp = _round_up(dim_head, 128)        # per-head width -> tile-aligned slices
    inner_p = heads * dp

    def pad_axis(x, axis, target):
        pad = target - x.shape[axis]
        if pad == 0:
            return x
        cfg = [(0, 0)] * x.ndim
        cfg[axis] = (0, pad)
        return jnp.pad(x, cfg)

    q_p = pad_axis(q, 2, qd_p)                       # (B, Nq, qd_p)
    k_p = pad_axis(k, 2, kvd_p)                      # (B, Nk, kvd_p)
    v_p = pad_axis(v, 2, kvd_p)                      # (B, Nk, kvd_p)

    def pad_in_proj(w, in_dim_p):
        # (in, heads*dim_head) -> (in_dim_p, heads*dp) with per-head zero pad.
        w3 = w.reshape(w.shape[0], heads, dim_head)
        w3 = pad_axis(w3, 2, dp)
        w3 = pad_axis(w3, 0, in_dim_p)
        return w3.reshape(in_dim_p, inner_p)

    wq_p = pad_in_proj(wq * scale, qd_p)             # scale folded into Wq
    wk_p = pad_in_proj(wk, kvd_p)
    wv_p = pad_in_proj(wv, kvd_p)

    wo3 = wo.reshape(heads, dim_head, q_dim)
    wo3 = pad_axis(wo3, 1, dp)
    wo3 = pad_axis(wo3, 2, qd_p)
    wo_p = wo3.reshape(inner_p, qd_p)                # (heads*dp, qd_p)

    bo_p = pad_axis(bo.reshape(1, q_dim), 1, qd_p)   # (1, qd_p), kept f32

    if use_bf16_matmul:
        # Pre-cast weights: halves weight DMA bytes + VMEM residency and
        # removes per-step converts.  f32 accumulation preserved in-kernel.
        wq_p = wq_p.astype(jnp.bfloat16)
        wk_p = wk_p.astype(jnp.bfloat16)
        wv_p = wv_p.astype(jnp.bfloat16)
        wo_p = wo_p.astype(jnp.bfloat16)

    # ---- Chip-aware batch fold / grid (>= 2 steps for v7x megacore). -------
    vmem_cap = _vmem_capacity_bytes()
    target_rows = 512 if vmem_cap >= (100 << 20) else 256   # v5e/v6e vs v7x
    Bb = _pick_batch_block(B, Nq, target_rows=target_rows)
    grid = (B // Bb,)

    kernel = _make_kernel(heads=heads, dp=dp, Bb=Bb, Nq=Nq, Nk=Nk, qd_p=qd_p,
                          use_bf16=use_bf16_matmul)

    # Advisory cost estimate (logical flops) for XLA scheduling.
    flops = 2 * B * (Nq * q_dim * inner_dim + 2 * Nk * kv_dim * inner_dim
                     + 2 * heads * Nq * Nk * dim_head + Nq * inner_dim * q_dim)
    w_itemsize = 2 if use_bf16_matmul else 4
    bytes_accessed = (4 * (q_p.size + k_p.size + v_p.size + bo_p.size
                           + B * Nq * qd_p)
                      + w_itemsize * (wq_p.size + wk_p.size + wv_p.size
                                      + wo_p.size))
    cost = pl.CostEstimate(flops=flops,
                           transcendentals=B * heads * Nq * Nk,
                           bytes_accessed=bytes_accessed)

    # VMEM budget: activation blocks are double-buffered, weights counted per
    # their buffer count, plus in-kernel f32 temporaries and headroom.
    act_in = 4 * Bb * (Nq * qd_p + 2 * Nk * kvd_p)
    act_out = 4 * Bb * Nq * qd_p
    w_bytes = w_itemsize * inner_p * (qd_p + 2 * kvd_p + qd_p) + 4 * qd_p
    tmp_bytes = 4 * (Bb * (Nq + 2 * Nk) * inner_p          # Q/K/V (f32)
                     + 2 * Bb * Nq * Nk                    # dots + p (one head)
                     + Bb * Nq * dp + Bb * Nq * qd_p)      # context + accum

    args = (q_p, k_p, v_p, wq_p, wk_p, wv_p, wo_p, bo_p)

    def build(single_buffer_weights):
        w_bufs = 1 if single_buffer_weights else 2
        vmem_est = 2 * (act_in + act_out) + w_bufs * w_bytes + tmp_bytes \
            + (2 << 20)
        vmem_limit = int(min(max(vmem_est, 16 << 20), int(vmem_cap * 0.65)))

        def wspec(shape):
            if single_buffer_weights:
                # Constant index_map -> no need to double-buffer these blocks.
                return pl.BlockSpec(shape, lambda b: (0, 0),
                                    pipeline_mode=pl.Buffered(1))
            return pl.BlockSpec(shape, lambda b: (0, 0))

        return pl.pallas_call(
            kernel,
            out_shape=jax.ShapeDtypeStruct((B, Nq, qd_p), q.dtype),
            grid_spec=pltpu.PrefetchScalarGridSpec(
                num_scalar_prefetch=0,
                grid=grid,
                in_specs=[
                    pl.BlockSpec((Bb, Nq, qd_p), lambda b: (b, 0, 0)),   # q
                    pl.BlockSpec((Bb, Nk, kvd_p), lambda b: (b, 0, 0)),  # k
                    pl.BlockSpec((Bb, Nk, kvd_p), lambda b: (b, 0, 0)),  # v
                    wspec((qd_p, inner_p)),                              # Wq*s
                    wspec((kvd_p, inner_p)),                             # Wk
                    wspec((kvd_p, inner_p)),                             # Wv
                    wspec((inner_p, qd_p)),                              # Wo
                    wspec((1, qd_p)),                                    # bo
                ],
                out_specs=pl.BlockSpec((Bb, Nq, qd_p), lambda b: (b, 0, 0)),
            ),
            compiler_params=pltpu.CompilerParams(
                dimension_semantics=("parallel",),
                vmem_limit_bytes=vmem_limit),
            cost_estimate=cost,
        )

    try:
        out_p = build(True)(*args)
    except Exception:
        # Fallback if single-buffered (pipeline_mode=Buffered(1)) weight
        # blocks are not supported by this jax build.
        out_p = build(False)(*args)

    if unpad_output and qd_p != q_dim:
        # NOTE: extra HBM copy; consumers that can take the 128-padded feature
        # dim should pass unpad_output=False.
        return out_p[..., :q_dim]
    return out_p


def reference_forward(q, k, v, params, *, heads, dim_head):
    """Pure-JAX reference mirroring the PyTorch forward."""
    wq, wk, wv, wo, bo = params
    scale = dim_head ** (-0.5)
    B, Nq, _ = q.shape
    _, Nk, _ = k.shape
    Q = q @ wq
    K = k @ wk
    V = v @ wv
    reh = lambda t, n: t.reshape(B, n, heads, dim_head).transpose(0, 2, 1, 3)
    Qh, Kh, Vh = reh(Q, Nq), reh(K, Nk), reh(V, Nk)
    dots = jnp.einsum("bhqd,bhkd->bhqk", Qh, Kh) * scale
    attn = jax.nn.softmax(dots, axis=-1)
    out = jnp.einsum("bhqk,bhkd->bhqd", attn, Vh)
    out = out.transpose(0, 2, 1, 3).reshape(B, Nq, heads * dim_head)
    return out @ wo + bo


if __name__ == "__main__":
    # Small, deterministic configuration consistent with the module.
    B, Nq, Nk = 2, 16, 8
    q_dim, kv_dim = 32, 24
    heads, dim_head = 2, 16
    inner_dim = heads * dim_head  # project_out=True (heads != 1)

    key = jax.random.PRNGKey(0)
    ks = jax.random.split(key, 8)
    q = jax.random.normal(ks[0], (B, Nq, q_dim), dtype=jnp.float32)
    k = jax.random.normal(ks[1], (B, Nk, kv_dim), dtype=jnp.float32)
    v = jax.random.normal(ks[2], (B, Nk, kv_dim), dtype=jnp.float32)

    # Parameters stored as (in, out) so x @ W matches PyTorch nn.Linear
    # (y = x @ W.T with W of shape (out, in)).
    wq = 0.05 * jax.random.normal(ks[3], (q_dim, inner_dim), dtype=jnp.float32)
    wk = 0.05 * jax.random.normal(ks[4], (kv_dim, inner_dim), dtype=jnp.float32)
    wv = 0.05 * jax.random.normal(ks[5], (kv_dim, inner_dim), dtype=jnp.float32)
    wo = 0.05 * jax.random.normal(ks[6], (inner_dim, q_dim), dtype=jnp.float32)
    bo = 0.01 * jax.random.normal(ks[7], (q_dim,), dtype=jnp.float32)
    params = (wq, wk, wv, wo, bo)

    ref = reference_forward(q, k, v, params, heads=heads, dim_head=dim_head)

    # f32 MXU path: tight tolerance (approx reciprocal ~2^-12 rel. error).
    out_f32 = attention_forward(q, k, v, params, heads=heads,
                                dim_head=dim_head, use_bf16_matmul=False)
    out_f32 = jax.block_until_ready(out_f32)
    assert out_f32.shape == (B, Nq, q_dim)
    assert jnp.allclose(out_f32, ref, atol=1e-3, rtol=1e-3), \
        "f32 path mismatch vs reference"

    # bf16 MXU path (default): looser tolerance for bf16 operand rounding.
    out_bf16 = attention_forward(q, k, v, params, heads=heads,
                                 dim_head=dim_head, use_bf16_matmul=True)
    out_bf16 = jax.block_until_ready(out_bf16)
    assert out_bf16.shape == (B, Nq, q_dim)
    assert jnp.allclose(out_bf16, ref, atol=2e-2, rtol=2e-2), \
        "bf16 path mismatch vs reference"

    print("KERNEL_OK")
</pallas_src>

<mosaic_0001>
module attributes {stable_mosaic.version = 11 : i64} {
  func.func @kernel(%arg0: i32, %arg1: memref<1x16x128xf32, #tpu.memory_space<vmem>>, %arg2: memref<1x8x128xf32, #tpu.memory_space<vmem>>, %arg3: memref<1x8x128xf32, #tpu.memory_space<vmem>>, %arg4: memref<128x256xf32, #tpu.memory_space<vmem>>, %arg5: memref<128x256xf32, #tpu.memory_space<vmem>>, %arg6: memref<128x256xf32, #tpu.memory_space<vmem>>, %arg7: memref<256x128xf32, #tpu.memory_space<vmem>>, %arg8: memref<1x128xf32, #tpu.memory_space<vmem>>, %arg9: memref<1x16x128xf32, #tpu.memory_space<vmem>>) attributes {dimension_semantics = [#tpu.dimension_semantics<parallel>], iteration_bounds = array<i64: 2>, scalar_prefetch = 0 : i64, scratch_operands = 0 : i64, tpu.core_type = #tpu.core_type<tc>, window_params = [{transform_indices = @transform_0, window_bounds = array<i64: 1, 16, 128>}, {transform_indices = @transform_1, window_bounds = array<i64: 1, 8, 128>}, {transform_indices = @transform_2, window_bounds = array<i64: 1, 8, 128>}, {pipeline_mode = #tpu.pipeline_mode<synchronous>, transform_indices = @transform_3, window_bounds = array<i64: 128, 256>}, {pipeline_mode = #tpu.pipeline_mode<synchronous>, transform_indices = @transform_4, window_bounds = array<i64: 128, 256>}, {pipeline_mode = #tpu.pipeline_mode<synchronous>, transform_indices = @transform_5, window_bounds = array<i64: 128, 256>}, {pipeline_mode = #tpu.pipeline_mode<synchronous>, transform_indices = @transform_6, window_bounds = array<i64: 256, 128>}, {pipeline_mode = #tpu.pipeline_mode<synchronous>, transform_indices = @transform_7, window_bounds = array<i64: 1, 128>}, {transform_indices = @transform_8, window_bounds = array<i64: 1, 16, 128>}]} {
    %c0 = arith.constant 0 : index
    %c0_0 = arith.constant 0 : index
    %c0_1 = arith.constant 0 : index
    %0 = vector.load %arg1[%c0, %c0_0, %c0_1] : memref<1x16x128xf32, #tpu.memory_space<vmem>>, vector<1x16x128xf32>
    %1 = vector.shape_cast %0 : vector<1x16x128xf32> to vector<16x128xf32>
    %c0_2 = arith.constant 0 : index
    %c0_3 = arith.constant 0 : index
    %c0_4 = arith.constant 0 : index
    %2 = vector.load %arg2[%c0_2, %c0_3, %c0_4] : memref<1x8x128xf32, #tpu.memory_space<vmem>>, vector<1x8x128xf32>
    %3 = vector.shape_cast %2 : vector<1x8x128xf32> to vector<8x128xf32>
    %c0_5 = arith.constant 0 : index
    %c0_6 = arith.constant 0 : index
    %c0_7 = arith.constant 0 : index
    %4 = vector.load %arg3[%c0_5, %c0_6, %c0_7] : memref<1x8x128xf32, #tpu.memory_space<vmem>>, vector<1x8x128xf32>
    %5 = vector.shape_cast %4 : vector<1x8x128xf32> to vector<8x128xf32>
    %c0_8 = arith.constant 0 : index
    %c0_9 = arith.constant 0 : index
    %6 = vector.load %arg4[%c0_8, %c0_9] : memref<128x256xf32, #tpu.memory_space<vmem>>, vector<128x256xf32>
    %cst = arith.constant dense<0.000000e+00> : vector<16x256xf32>
    %7 = tpu.matmul %1, %6, %cst {dimension_numbers = #tpu.dot_dimension_numbers<[1], [0], [0], [1], [0, 0, 1, 1], [], []>} : vector<16x128xf32>, vector<128x256xf32>, vector<16x256xf32> -> vector<16x256xf32>
    %c0_10 = arith.constant 0 : index
    %c0_11 = arith.constant 0 : index
    %8 = vector.load %arg5[%c0_10, %c0_11] : memref<128x256xf32, #tpu.memory_space<vmem>>, vector<128x256xf32>
    %cst_12 = arith.constant dense<0.000000e+00> : vector<8x256xf32>
    %9 = tpu.matmul %3, %8, %cst_12 {dimension_numbers = #tpu.dot_dimension_numbers<[1], [0], [0], [1], [0, 0, 1, 1], [], []>} : vector<8x128xf32>, vector<128x256xf32>, vector<8x256xf32> -> vector<8x256xf32>
    %c0_13 = arith.constant 0 : index
    %c0_14 = arith.constant 0 : index
    %10 = vector.load %arg6[%c0_13, %c0_14] : memref<128x256xf32, #tpu.memory_space<vmem>>, vector<128x256xf32>
    %cst_15 = arith.constant dense<0.000000e+00> : vector<8x256xf32>
    %11 = tpu.matmul %5, %10, %cst_15 {dimension_numbers = #tpu.dot_dimension_numbers<[1], [0], [0], [1], [0, 0, 1, 1], [], []>} : vector<8x128xf32>, vector<128x256xf32>, vector<8x256xf32> -> vector<8x256xf32>
    %12 = vector.shape_cast %7 : vector<16x256xf32> to vector<1x16x256xf32>
    %13 = vector.shape_cast %9 : vector<8x256xf32> to vector<1x8x256xf32>
    %14 = vector.shape_cast %11 : vector<8x256xf32> to vector<1x8x256xf32>
    %cst_16 = arith.constant 0.000000e+00 : f32
    %15 = vector.broadcast %cst_16 : f32 to vector<16x128xf32>
    %16 = vector.extract_strided_slice %12 {offsets = [0, 0, 0], sizes = [1, 16, 128], strides = [1, 1, 1]} : vector<1x16x256xf32> to vector<1x16x128xf32>
    %17 = vector.extract_strided_slice %13 {offsets = [0, 0, 0], sizes = [1, 8, 128], strides = [1, 1, 1]} : vector<1x8x256xf32> to vector<1x8x128xf32>
    %18 = vector.extract_strided_slice %14 {offsets = [0, 0, 0], sizes = [1, 8, 128], strides = [1, 1, 1]} : vector<1x8x256xf32> to vector<1x8x128xf32>
    "tpu.trace_start"() <{level = 10 : i32, message = "bqd,bkd->bqk"}> : () -> ()
    %cst_17 = arith.constant dense<0.000000e+00> : vector<1x16x8xf32>
    %19 = tpu.matmul %16, %17, %cst_17 {dimension_numbers = #tpu.dot_dimension_numbers<[2], [2], [1], [1], [0, 0, 0, 1, 1, 1], [0], [0]>} : vector<1x16x128xf32>, vector<1x8x128xf32>, vector<1x16x8xf32> -> vector<1x16x8xf32>
    "tpu.trace_stop"() : () -> ()
    %cst_18 = arith.constant dense<0xFF800000> : vector<1x16xf32>
    %20 = vector.multi_reduction <maximumf>, %19, %cst_18 [2] : vector<1x16x8xf32> to vector<1x16xf32>
    %21 = vector.shape_cast %20 : vector<1x16xf32> to vector<1x16x1xf32>
    %22 = vector.broadcast %21 : vector<1x16x1xf32> to vector<1x16x8xf32>
    %23 = arith.subf %19, %22 : vector<1x16x8xf32>
    %24 = math.exp %23 : vector<1x16x8xf32>
    %cst_19 = arith.constant dense<0.000000e+00> : vector<1x16xf32>
    %25 = vector.multi_reduction <add>, %24, %cst_19 [2] : vector<1x16x8xf32> to vector<1x16xf32>
    %26 = vector.shape_cast %25 : vector<1x16xf32> to vector<1x16x1xf32>
    "tpu.trace_start"() <{level = 10 : i32, message = "bqk,bkd->bqd"}> : () -> ()
    %cst_20 = arith.constant dense<0.000000e+00> : vector<1x16x128xf32>
    %27 = tpu.matmul %24, %18, %cst_20 {dimension_numbers = #tpu.dot_dimension_numbers<[2], [1], [1], [2], [0, 0, 0, 1, 1, 2], [0], [0]>} : vector<1x16x8xf32>, vector<1x8x128xf32>, vector<1x16x128xf32> -> vector<1x16x128xf32>
    "tpu.trace_stop"() : () -> ()
    %28 = tpu.reciprocal %26 {approx = true} : vector<1x16x1xf32> -> vector<1x16x1xf32>
    %29 = vector.broadcast %28 : vector<1x16x1xf32> to vector<1x16x128xf32>
    %30 = arith.mulf %27, %29 : vector<1x16x128xf32>
    %31 = vector.shape_cast %30 : vector<1x16x128xf32> to vector<16x128xf32>
    %c0_21 = arith.constant 0 : index
    %c0_22 = arith.constant 0 : index
    %32 = vector.load %arg7[%c0_21, %c0_22] : memref<256x128xf32, #tpu.memory_space<vmem>>, vector<128x128xf32>
    %cst_23 = arith.constant dense<0.000000e+00> : vector<16x128xf32>
    %33 = tpu.matmul %31, %32, %cst_23 {dimension_numbers = #tpu.dot_dimension_numbers<[1], [0], [0], [1], [0, 0, 1, 1], [], []>} : vector<16x128xf32>, vector<128x128xf32>, vector<16x128xf32> -> vector<16x128xf32>
    %34 = arith.addf %15, %33 : vector<16x128xf32>
    %35 = vector.extract_strided_slice %12 {offsets = [0, 0, 128], sizes = [1, 16, 128], strides = [1, 1, 1]} : vector<1x16x256xf32> to vector<1x16x128xf32>
    %36 = vector.extract_strided_slice %13 {offsets = [0, 0, 128], sizes = [1, 8, 128], strides = [1, 1, 1]} : vector<1x8x256xf32> to vector<1x8x128xf32>
    %37 = vector.extract_strided_slice %14 {offsets = [0, 0, 128], sizes = [1, 8, 128], strides = [1, 1, 1]} : vector<1x8x256xf32> to vector<1x8x128xf32>
    "tpu.trace_start"() <{level = 10 : i32, message = "bqd,bkd->bqk"}> : () -> ()
    %cst_24 = arith.constant dense<0.000000e+00> : vector<1x16x8xf32>
    %38 = tpu.matmul %35, %36, %cst_24 {dimension_numbers = #tpu.dot_dimension_numbers<[2], [2], [1], [1], [0, 0, 0, 1, 1, 1], [0], [0]>} : vector<1x16x128xf32>, vector<1x8x128xf32>, vector<1x16x8xf32> -> vector<1x16x8xf32>
    "tpu.trace_stop"() : () -> ()
    %cst_25 = arith.constant dense<0xFF800000> : vector<1x16xf32>
    %39 = vector.multi_reduction <maximumf>, %38, %cst_25 [2] : vector<1x16x8xf32> to vector<1x16xf32>
    %40 = vector.shape_cast %39 : vector<1x16xf32> to vector<1x16x1xf32>
    %41 = vector.broadcast %40 : vector<1x16x1xf32> to vector<1x16x8xf32>
    %42 = arith.subf %38, %41 : vector<1x16x8xf32>
    %43 = math.exp %42 : vector<1x16x8xf32>
    %cst_26 = arith.constant dense<0.000000e+00> : vector<1x16xf32>
    %44 = vector.multi_reduction <add>, %43, %cst_26 [2] : vector<1x16x8xf32> to vector<1x16xf32>
    %45 = vector.shape_cast %44 : vector<1x16xf32> to vector<1x16x1xf32>
    "tpu.trace_start"() <{level = 10 : i32, message = "bqk,bkd->bqd"}> : () -> ()
    %cst_27 = arith.constant dense<0.000000e+00> : vector<1x16x128xf32>
    %46 = tpu.matmul %43, %37, %cst_27 {dimension_numbers = #tpu.dot_dimension_numbers<[2], [1], [1], [2], [0, 0, 0, 1, 1, 2], [0], [0]>} : vector<1x16x8xf32>, vector<1x8x128xf32>, vector<1x16x128xf32> -> vector<1x16x128xf32>
    "tpu.trace_stop"() : () -> ()
    %47 = tpu.reciprocal %45 {approx = true} : vector<1x16x1xf32> -> vector<1x16x1xf32>
    %48 = vector.broadcast %47 : vector<1x16x1xf32> to vector<1x16x128xf32>
    %49 = arith.mulf %46, %48 : vector<1x16x128xf32>
    %50 = vector.shape_cast %49 : vector<1x16x128xf32> to vector<16x128xf32>
    %c128 = arith.constant 128 : index
    %c0_28 = arith.constant 0 : index
    %51 = vector.load %arg7[%c128, %c0_28] : memref<256x128xf32, #tpu.memory_space<vmem>>, vector<128x128xf32>
    %cst_29 = arith.constant dense<0.000000e+00> : vector<16x128xf32>
    %52 = tpu.matmul %50, %51, %cst_29 {dimension_numbers = #tpu.dot_dimension_numbers<[1], [0], [0], [1], [0, 0, 1, 1], [], []>} : vector<16x128xf32>, vector<128x128xf32>, vector<16x128xf32> -> vector<16x128xf32>
    %53 = arith.addf %34, %52 : vector<16x128xf32>
    %c0_30 = arith.constant 0 : index
    %c0_31 = arith.constant 0 : index
    %54 = vector.load %arg8[%c0_30, %c0_31] : memref<1x128xf32, #tpu.memory_space<vmem>>, vector<1x128xf32>
    %55 = vector.broadcast %54 : vector<1x128xf32> to vector<16x128xf32>
    %56 = arith.addf %53, %55 : vector<16x128xf32>
    %57 = vector.shape_cast %56 : vector<16x128xf32> to vector<1x16x128xf32>
    %c0_32 = arith.constant 0 : index
    %c0_33 = arith.constant 0 : index
    %c0_34 = arith.constant 0 : index
    %58 = vector.load %arg9[%c0_32, %c0_33, %c0_34] : memref<1x16x128xf32, #tpu.memory_space<vmem>>, vector<1x16x128xf32>
    tpu.vector_store %arg9[%c0_32, %c0_33, %c0_34], %57 {strides = array<i32>} : memref<1x16x128xf32, #tpu.memory_space<vmem>>, vector<1x16x128xf32>,
    return
  }
  func.func @transform_0(%arg0: i32) -> (i32, i32, i32) {
    %c0_i32 = arith.constant 0 : i32
    %c0_i32_0 = arith.constant 0 : i32
    %c0_i32_1 = arith.constant 0 : i32
    return %arg0, %c0_i32, %c0_i32_0 : i32, i32, i32
  }
  func.func @transform_1(%arg0: i32) -> (i32, i32, i32) {
    %c0_i32 = arith.constant 0 : i32
    %c0_i32_0 = arith.constant 0 : i32
    %c0_i32_1 = arith.constant 0 : i32
    return %arg0, %c0_i32, %c0_i32_0 : i32, i32, i32
  }
  func.func @transform_2(%arg0: i32) -> (i32, i32, i32) {
    %c0_i32 = arith.constant 0 : i32
    %c0_i32_0 = arith.constant 0 : i32
    %c0_i32_1 = arith.constant 0 : i32
    return %arg0, %c0_i32, %c0_i32_0 : i32, i32, i32
  }
  func.func @transform_3(%arg0: i32) -> (i32, i32) {
    %c0_i32 = arith.constant 0 : i32
    %c0_i32_0 = arith.constant 0 : i32
    %c0_i32_1 = arith.constant 0 : i32
    return %c0_i32, %c0_i32_0 : i32, i32
  }
  func.func @transform_4(%arg0: i32) -> (i32, i32) {
    %c0_i32 = arith.constant 0 : i32
    %c0_i32_0 = arith.constant 0 : i32
    %c0_i32_1 = arith.constant 0 : i32
    return %c0_i32, %c0_i32_0 : i32, i32
  }
  func.func @transform_5(%arg0: i32) -> (i32, i32) {
    %c0_i32 = arith.constant 0 : i32
    %c0_i32_0 = arith.constant 0 : i32
    %c0_i32_1 = arith.constant 0 : i32
    return %c0_i32, %c0_i32_0 : i32, i32
  }
  func.func @transform_6(%arg0: i32) -> (i32, i32) {
    %c0_i32 = arith.constant 0 : i32
    %c0_i32_0 = arith.constant 0 : i32
    %c0_i32_1 = arith.constant 0 : i32
    return %c0_i32, %c0_i32_0 : i32, i32
  }
  func.func @transform_7(%arg0: i32) -> (i32, i32) {
    %c0_i32 = arith.constant 0 : i32
    %c0_i32_0 = arith.constant 0 : i32
    %c0_i32_1 = arith.constant 0 : i32
    return %c0_i32, %c0_i32_0 : i32, i32
  }
  func.func @transform_8(%arg0: i32) -> (i32, i32, i32) {
    %c0_i32 = arith.constant 0 : i32
    %c0_i32_0 = arith.constant 0 : i32
    %c0_i32_1 = arith.constant 0 : i32
    return %arg0, %c0_i32, %c0_i32_0 : i32, i32, i32
  }
}

module attributes {stable_mosaic.version = 11 : i64} {
  func.func @kernel(%arg0: i32, %arg1: memref<1x16x128xf32, #tpu.memory_space<vmem>>, %arg2: memref<1x8x128xf32, #tpu.memory_space<vmem>>, %arg3: memref<1x8x128xf32, #tpu.memory_space<vmem>>, %arg4: memref<128x256xf32, #tpu.memory_space<vmem>>, %arg5: memref<128x256xf32, #tpu.memory_space<vmem>>, %arg6: memref<128x256xf32, #tpu.memory_space<vmem>>, %arg7: memref<256x128xf32, #tpu.memory_space<vmem>>, %arg8: memref<1x128xf32, #tpu.memory_space<vmem>>, %arg9: memref<1x16x128xf32, #tpu.memory_space<vmem>>) attributes {dimension_semantics = [#tpu.dimension_semantics<parallel>], iteration_bounds = array<i64: 2>, scalar_prefetch = 0 : i64, scratch_operands = 0 : i64, tpu.core_type = #tpu.core_type<tc>, window_params = [{transform_indices = @transform_0, window_bounds = array<i64: 1, 16, 128>}, {transform_indices = @transform_1, window_bounds = array<i64: 1, 8, 128>}, {transform_indices = @transform_2, window_bounds = array<i64: 1, 8, 128>}, {pipeline_mode = #tpu.pipeline_mode<synchronous>, transform_indices = @transform_3, window_bounds = array<i64: 128, 256>}, {pipeline_mode = #tpu.pipeline_mode<synchronous>, transform_indices = @transform_4, window_bounds = array<i64: 128, 256>}, {pipeline_mode = #tpu.pipeline_mode<synchronous>, transform_indices = @transform_5, window_bounds = array<i64: 128, 256>}, {pipeline_mode = #tpu.pipeline_mode<synchronous>, transform_indices = @transform_6, window_bounds = array<i64: 256, 128>}, {pipeline_mode = #tpu.pipeline_mode<synchronous>, transform_indices = @transform_7, window_bounds = array<i64: 1, 128>}, {transform_indices = @transform_8, window_bounds = array<i64: 1, 16, 128>}]} {
    %c0 = arith.constant 0 : index
    %c0_0 = arith.constant 0 : index
    %c0_1 = arith.constant 0 : index
    %0 = vector.load %arg1[%c0, %c0_0, %c0_1] : memref<1x16x128xf32, #tpu.memory_space<vmem>>, vector<1x16x128xf32>
    %1 = vector.shape_cast %0 : vector<1x16x128xf32> to vector<16x128xf32>
    %c0_2 = arith.constant 0 : index
    %c0_3 = arith.constant 0 : index
    %c0_4 = arith.constant 0 : index
    %2 = vector.load %arg2[%c0_2, %c0_3, %c0_4] : memref<1x8x128xf32, #tpu.memory_space<vmem>>, vector<1x8x128xf32>
    %3 = vector.shape_cast %2 : vector<1x8x128xf32> to vector<8x128xf32>
    %c0_5 = arith.constant 0 : index
    %c0_6 = arith.constant 0 : index
    %c0_7 = arith.constant 0 : index
    %4 = vector.load %arg3[%c0_5, %c0_6, %c0_7] : memref<1x8x128xf32, #tpu.memory_space<vmem>>, vector<1x8x128xf32>
    %5 = vector.shape_cast %4 : vector<1x8x128xf32> to vector<8x128xf32>
    %c0_8 = arith.constant 0 : index
    %c0_9 = arith.constant 0 : index
    %6 = vector.load %arg4[%c0_8, %c0_9] : memref<128x256xf32, #tpu.memory_space<vmem>>, vector<128x256xf32>
    %cst = arith.constant dense<0.000000e+00> : vector<16x256xf32>
    %7 = tpu.matmul %1, %6, %cst {dimension_numbers = #tpu.dot_dimension_numbers<[1], [0], [0], [1], [0, 0, 1, 1], [], []>} : vector<16x128xf32>, vector<128x256xf32>, vector<16x256xf32> -> vector<16x256xf32>
    %c0_10 = arith.constant 0 : index
    %c0_11 = arith.constant 0 : index
    %8 = vector.load %arg5[%c0_10, %c0_11] : memref<128x256xf32, #tpu.memory_space<vmem>>, vector<128x256xf32>
    %cst_12 = arith.constant dense<0.000000e+00> : vector<8x256xf32>
    %9 = tpu.matmul %3, %8, %cst_12 {dimension_numbers = #tpu.dot_dimension_numbers<[1], [0], [0], [1], [0, 0, 1, 1], [], []>} : vector<8x128xf32>, vector<128x256xf32>, vector<8x256xf32> -> vector<8x256xf32>
    %c0_13 = arith.constant 0 : index
    %c0_14 = arith.constant 0 : index
    %10 = vector.load %arg6[%c0_13, %c0_14] : memref<128x256xf32, #tpu.memory_space<vmem>>, vector<128x256xf32>
    %cst_15 = arith.constant dense<0.000000e+00> : vector<8x256xf32>
    %11 = tpu.matmul %5, %10, %cst_15 {dimension_numbers = #tpu.dot_dimension_numbers<[1], [0], [0], [1], [0, 0, 1, 1], [], []>} : vector<8x128xf32>, vector<128x256xf32>, vector<8x256xf32> -> vector<8x256xf32>
    %12 = vector.shape_cast %7 : vector<16x256xf32> to vector<1x16x256xf32>
    %13 = vector.shape_cast %9 : vector<8x256xf32> to vector<1x8x256xf32>
    %14 = vector.shape_cast %11 : vector<8x256xf32> to vector<1x8x256xf32>
    %cst_16 = arith.constant 0.000000e+00 : f32
    %15 = vector.broadcast %cst_16 : f32 to vector<16x128xf32>
    %16 = vector.extract_strided_slice %12 {offsets = [0, 0, 0], sizes = [1, 16, 128], strides = [1, 1, 1]} : vector<1x16x256xf32> to vector<1x16x128xf32>
    %17 = vector.extract_strided_slice %13 {offsets = [0, 0, 0], sizes = [1, 8, 128], strides = [1, 1, 1]} : vector<1x8x256xf32> to vector<1x8x128xf32>
    %18 = vector.extract_strided_slice %14 {offsets = [0, 0, 0], sizes = [1, 8, 128], strides = [1, 1, 1]} : vector<1x8x256xf32> to vector<1x8x128xf32>
    "tpu.trace_start"() <{level = 10 : i32, message = "bqd,bkd->bqk"}> : () -> ()
    %cst_17 = arith.constant dense<0.000000e+00> : vector<1x16x8xf32>
    %19 = tpu.matmul %16, %17, %cst_17 {dimension_numbers = #tpu.dot_dimension_numbers<[2], [2], [1], [1], [0, 0, 0, 1, 1, 1], [0], [0]>} : vector<1x16x128xf32>, vector<1x8x128xf32>, vector<1x16x8xf32> -> vector<1x16x8xf32>
    "tpu.trace_stop"() : () -> ()
    %cst_18 = arith.constant dense<0xFF800000> : vector<1x16xf32>
    %20 = vector.multi_reduction <maximumf>, %19, %cst_18 [2] : vector<1x16x8xf32> to vector<1x16xf32>
    %21 = vector.shape_cast %20 : vector<1x16xf32> to vector<1x16x1xf32>
    %22 = vector.broadcast %21 : vector<1x16x1xf32> to vector<1x16x8xf32>
    %23 = arith.subf %19, %22 : vector<1x16x8xf32>
    %24 = math.exp %23 : vector<1x16x8xf32>
    %cst_19 = arith.constant dense<0.000000e+00> : vector<1x16xf32>
    %25 = vector.multi_reduction <add>, %24, %cst_19 [2] : vector<1x16x8xf32> to vector<1x16xf32>
    %26 = vector.shape_cast %25 : vector<1x16xf32> to vector<1x16x1xf32>
    "tpu.trace_start"() <{level = 10 : i32, message = "bqk,bkd->bqd"}> : () -> ()
    %cst_20 = arith.constant dense<0.000000e+00> : vector<1x16x128xf32>
    %27 = tpu.matmul %24, %18, %cst_20 {dimension_numbers = #tpu.dot_dimension_numbers<[2], [1], [1], [2], [0, 0, 0, 1, 1, 2], [0], [0]>} : vector<1x16x8xf32>, vector<1x8x128xf32>, vector<1x16x128xf32> -> vector<1x16x128xf32>
    "tpu.trace_stop"() : () -> ()
    %28 = tpu.reciprocal %26 {approx = true} : vector<1x16x1xf32> -> vector<1x16x1xf32>
    %29 = vector.broadcast %28 : vector<1x16x1xf32> to vector<1x16x128xf32>
    %30 = arith.mulf %27, %29 : vector<1x16x128xf32>
    %31 = vector.shape_cast %30 : vector<1x16x128xf32> to vector<16x128xf32>
    %c0_21 = arith.constant 0 : index
    %c0_22 = arith.constant 0 : index
    %32 = vector.load %arg7[%c0_21, %c0_22] : memref<256x128xf32, #tpu.memory_space<vmem>>, vector<128x128xf32>
    %cst_23 = arith.constant dense<0.000000e+00> : vector<16x128xf32>
    %33 = tpu.matmul %31, %32, %cst_23 {dimension_numbers = #tpu.dot_dimension_numbers<[1], [0], [0], [1], [0, 0, 1, 1], [], []>} : vector<16x128xf32>, vector<128x128xf32>, vector<16x128xf32> -> vector<16x128xf32>
    %34 = arith.addf %15, %33 : vector<16x128xf32>
    %35 = vector.extract_strided_slice %12 {offsets = [0, 0, 128], sizes = [1, 16, 128], strides = [1, 1, 1]} : vector<1x16x256xf32> to vector<1x16x128xf32>
    %36 = vector.extract_strided_slice %13 {offsets = [0, 0, 128], sizes = [1, 8, 128], strides = [1, 1, 1]} : vector<1x8x256xf32> to vector<1x8x128xf32>
    %37 = vector.extract_strided_slice %14 {offsets = [0, 0, 128], sizes = [1, 8, 128], strides = [1, 1, 1]} : vector<1x8x256xf32> to vector<1x8x128xf32>
    "tpu.trace_start"() <{level = 10 : i32, message = "bqd,bkd->bqk"}> : () -> ()
    %cst_24 = arith.constant dense<0.000000e+00> : vector<1x16x8xf32>
    %38 = tpu.matmul %35, %36, %cst_24 {dimension_numbers = #tpu.dot_dimension_numbers<[2], [2], [1], [1], [0, 0, 0, 1, 1, 1], [0], [0]>} : vector<1x16x128xf32>, vector<1x8x128xf32>, vector<1x16x8xf32> -> vector<1x16x8xf32>
    "tpu.trace_stop"() : () -> ()
    %cst_25 = arith.constant dense<0xFF800000> : vector<1x16xf32>
    %39 = vector.multi_reduction <maximumf>, %38, %cst_25 [2] : vector<1x16x8xf32> to vector<1x16xf32>
    %40 = vector.shape_cast %39 : vector<1x16xf32> to vector<1x16x1xf32>
    %41 = vector.broadcast %40 : vector<1x16x1xf32> to vector<1x16x8xf32>
    %42 = arith.subf %38, %41 : vector<1x16x8xf32>
    %43 = math.exp %42 : vector<1x16x8xf32>
    %cst_26 = arith.constant dense<0.000000e+00> : vector<1x16xf32>
    %44 = vector.multi_reduction <add>, %43, %cst_26 [2] : vector<1x16x8xf32> to vector<1x16xf32>
    %45 = vector.shape_cast %44 : vector<1x16xf32> to vector<1x16x1xf32>
    "tpu.trace_start"() <{level = 10 : i32, message = "bqk,bkd->bqd"}> : () -> ()
    %cst_27 = arith.constant dense<0.000000e+00> : vector<1x16x128xf32>
    %46 = tpu.matmul %43, %37, %cst_27 {dimension_numbers = #tpu.dot_dimension_numbers<[2], [1], [1], [2], [0, 0, 0, 1, 1, 2], [0], [0]>} : vector<1x16x8xf32>, vector<1x8x128xf32>, vector<1x16x128xf32> -> vector<1x16x128xf32>
    "tpu.trace_stop"() : () -> ()
    %47 = tpu.reciprocal %45 {approx = true} : vector<1x16x1xf32> -> vector<1x16x1xf32>
    %48 = vector.broadcast %47 : vector<1x16x1xf32> to vector<1x16x128xf32>
    %49 = arith.mulf %46, %48 : vector<1x16x128xf32>
    %50 = vector.shape_cast %49 : vector<1x16x128xf32> to vector<16x128xf32>
    %c128 = arith.constant 128 : index
    %c0_28 = arith.constant 0 : index
    %51 = vector.load %arg7[%c128, %c0_28] : memref<256x128xf32, #tpu.memory_space<vmem>>, vector<128x128xf32>
    %cst_29 = arith.constant dense<0.000000e+00> : vector<16x128xf32>
    %52 = tpu.matmul %50, %51, %cst_29 {dimension_numbers = #tpu.dot_dimension_numbers<[1], [0], [0], [1], [0, 0, 1, 1], [], []>} : vector<16x128xf32>, vector<128x128xf32>, vector<16x128xf32> -> vector<16x128xf32>
    %53 = arith.addf %34, %52 : vector<16x128xf32>
    %c0_30 = arith.constant 0 : index
    %c0_31 = arith.constant 0 : index
    %54 = vector.load %arg8[%c0_30, %c0_31] : memref<1x128xf32, #tpu.memory_space<vmem>>, vector<1x128xf32>
    %55 = vector.broadcast %54 : vector<1x128xf32> to vector<16x128xf32>
    %56 = arith.addf %53, %55 : vector<16x128xf32>
    %57 = vector.shape_cast %56 : vector<16x128xf32> to vector<1x16x128xf32>
    %c0_32 = arith.constant 0 : index
    %c0_33 = arith.constant 0 : index
    %c0_34 = arith.constant 0 : index
    %58 = vector.load %arg9[%c0_32, %c0_33, %c0_34] : memref<1x16x128xf32, #tpu.memory_space<vmem>>, vector<1x16x128xf32>
    tpu.vector_store %arg9[%c0_32, %c0_33, %c0_34], %57 {strides = array<i32>} : memref<1x16x128xf32, #tpu.memory_space<vmem>>, vector<1x16x128xf32>,
    return
  }
  func.func @transform_0(%arg0: i32) -> (i32, i32, i32) {
    %c0_i32 = arith.constant 0 : i32
    %c0_i32_0 = arith.constant 0 : i32
    %c0_i32_1 = arith.constant 0 : i32
    return %arg0, %c0_i32, %c0_i32_0 : i32, i32, i32
  }
  func.func @transform_1(%arg0: i32) -> (i32, i32, i32) {
    %c0_i32 = arith.constant 0 : i32
    %c0_i32_0 = arith.constant 0 : i32
    %c0_i32_1 = arith.constant 0 : i32
    return %arg0, %c0_i32, %c0_i32_0 : i32, i32, i32
  }
  func.func @transform_2(%arg0: i32) -> (i32, i32, i32) {
    %c0_i32 = arith.constant 0 : i32
    %c0_i32_0 = arith.constant 0 : i32
    %c0_i32_1 = arith.constant 0 : i32
    return %arg0, %c0_i32, %c0_i32_0 : i32, i32, i32
  }
  func.func @transform_3(%arg0: i32) -> (i32, i32) {
    %c0_i32 = arith.constant 0 : i32
    %c0_i32_0 = arith.constant 0 : i32
    %c0_i32_1 = arith.constant 0 : i32
    return %c0_i32, %c0_i32_0 : i32, i32
  }
  func.func @transform_4(%arg0: i32) -> (i32, i32) {
    %c0_i32 = arith.constant 0 : i32
    %c0_i32_0 = arith.constant 0 : i32
    %c0_i32_1 = arith.constant 0 : i32
    return %c0_i32, %c0_i32_0 : i32, i32
  }
  func.func @transform_5(%arg0: i32) -> (i32, i32) {
    %c0_i32 = arith.constant 0 : i32
    %c0_i32_0 = arith.constant 0 : i32
    %c0_i32_1 = arith.constant 0 : i32
    return %c0_i32, %c0_i32_0 : i32, i32
  }
  func.func @transform_6(%arg0: i32) -> (i32, i32) {
    %c0_i32 = arith.constant 0 : i32
    %c0_i32_0 = arith.constant 0 : i32
    %c0_i32_1 = arith.constant 0 : i32
    return %c0_i32, %c0_i32_0 : i32, i32
  }
  func.func @transform_7(%arg0: i32) -> (i32, i32) {
    %c0_i32 = arith.constant 0 : i32
    %c0_i32_0 = arith.constant 0 : i32
    %c0_i32_1 = arith.constant 0 : i32
    return %c0_i32, %c0_i32_0 : i32, i32
  }
  func.func @transform_8(%arg0: i32) -> (i32, i32, i32) {
    %c0_i32 = arith.constant 0 : i32
    %c0_i32_0 = arith.constant 0 : i32
    %c0_i32_1 = arith.constant 0 : i32
    return %arg0, %c0_i32, %c0_i32_0 : i32, i32, i32
  }
}

</mosaic_0001>

<bundles_post_ra>
// kernel: tpu_custom_call.1
= control target key start
LH: loop header
LB: loop body
LE: loop exit
PB: predicated region body
PF: predicated region fallthrough
CT: control target
= control target key end

     0   :  { %s2701_s0 = inlined_call_operand.hbm [shape: f32[2,16,128], index: 0, kind: input, shape index: {}]   ;;  %s2702_s1 = inlined_call_operand.hbm [shape: f32[2,8,128], index: 1, kind: input, shape index: {}]   ;;  %s2703_s2 = inlined_call_operand.hbm [shape: f32[2,8,128], index: 2, kind: input, shape index: {}]   ;;  %s2704_s3 = inlined_call_operand.hbm [shape: f32[128,256], index: 3, kind: input, shape index: {}]   ;;  %s2705_s4 = inlined_call_operand.hbm [shape: f32[128,256], index: 4, kind: input, shape index: {}]   ;;  %s2706_s5 = inlined_call_operand.hbm [shape: f32[128,256], index: 5, kind: input, shape index: {}]   ;;  %s2707_s6 = inlined_call_operand.hbm [shape: f32[256,128], index: 6, kind: input, shape index: {}]   ;;  %s2708_s7 = inlined_call_operand.vmem [shape: f32[1,128], index: 7, kind: input, shape index: {}]   ;;  %s2709_s8 = inlined_call_operand.hbm [shape: f32[2,16,128], index: 8, kind: output, shape index: {}]  }
   0x1   :  { %2730 = sst [smem:[#allocation25_spill]] %s2702_s1 }
   0x2   :  { %2731 = sst [smem:[#allocation26_spill]] %s2704_s3 }
   0x3   :  { %2732 = sst [smem:[#allocation27_spill]] %s2706_s5 }
   0x4   :  { %2733 = sst [smem:[#allocation28_spill]] %s2708_s7 }
   0x5   :  { %2734 = sst [smem:[#allocation29_spill]] %s2709_s8 }
   0x6   :  { %13 = vsyncpa [#allocation3], 0 }
   0x7   :  { %15 = vsyncpa [#allocation3 + $0x1], 0 }
   0x8   :  { %16 = vsyncpa [#allocation6], 0 }
   0x9   :  { %18 = vsyncpa [#allocation6 + $0x1], 0 }
   0xa   :  { %19 = vsyncpa [#allocation9], 0 }
   0xb   :  { %20 = vsyncpa [#allocation12], 0 }
   0xc   :  { %21 = vsyncpa [#allocation4], 0 }
   0xd   :  { %23 = vsyncpa [#allocation4 + $0x1], 0  ;;  %s2287_s27 = smov 0   ;;  %s2289_s28 = smov 0  }
   0xe   :  { %s2291_s29 = smov 0   ;;  %s2293_s30 = smov 0  }
   0xf LB: > { %2735 = sst [smem:[#allocation20_spill]] %s2213_s27  ;;  %s2227_s9 = smov [#allocation8]   ;;  %s2225_s30 = sphi %s2293_s30, %s2772_s30   ;;  %s2221_s29 = sphi %s2291_s29, %s2774_s29   ;;  %s2217_s28 = sphi %s2289_s28, %s2776_s28   ;;  %s2213_s27 = sphi %s2287_s27, %s2775_s27  }
  0x10   : > { %2736 = sst [smem:[#allocation21_spill]] %s2221_s29  ;;  %s255_s10 = sshll.u32 %s2227_s9, 4  ;;  %s2313_s10 = int_to_ptr.vmem [resolvable:$true] %s255_s10 }
  0x11   : > { %s2308_s11 = sadd.s32 4294967295, %s2225_s30   ;;  %p1491_p0 = scmp.ge.s32.totalorder %s2225_s30, 1 }
  0x12   : > { %p2716_p1 = scmp.eq.s32.totalorder %s2308_s11, 0  ;;  %p243_p2 = scmp.lt.s32.totalorder %s2225_s30, 3 }
  0x13   : > { %s2228_s13 = smov [#allocation11]   ;;  %s2739_s3 = sld [smem:[#allocation26_spill]] }
  0x14   : > { %p2315_p3 = pnand %p1491_p0, %p243_p2  ;;  %s281_s14 = sshll.u32 %s2228_s13, 4  ;;  %s2328_s14 = int_to_ptr.vmem [resolvable:$true] %s281_s14 }
  0x16   : > { %s2737_s12 = scalar_select %p2315_p3, 1, 0 }
  0x17   : > { %p1849_p5 = pneg %p2315_p3 }
  0x19   : > { %p2324_p6 = pnand %p1849_p5, %p2716_p1  ;;  %s1945_s18 = scalar_lea.hbm %s2739_s3, 4096 }
  0x1a   : > { %p1946_p7 = scmp.ne.s32.totalorder %s2739_s3, %s1945_s18  ;;  %p1952_p11 = scmp.lt.u32.totalorder %s1945_s18, %s2739_s3 }
  0x1b   : > { %s2738_s15 = scalar_select %p2324_p6, 1, 0 }
  0x1c   : > { %p2338_p8 = pneg %p2324_p6 }
  0x1e   : > { %s2740_s21 = scalar_select %p2338_p8, 1, 0 }
  0x1f   : > { %p1948_p9 = pnand %p2338_p8, %p1946_p7 }
  0x21   : > { %p1949_p10 = pneg %p1948_p9 }
  0x23   : > { %p1954_p12 = pnand %p1952_p11, %p1949_p10 }
  0x25   : > { %1957 = shalt.err (!%p1954_p12)
}
  0x26   : > { %s1958_s24 = scalar_lea.vmem %s2313_s10, 4096  ;;  %p1966_p5 = scmp.lt.s32.totalorder %s2313_s10, %s2313_s10 }
  0x27   : > { %p1959_p13 = scmp.ne.s32.totalorder %s2313_s10, %s1958_s24  ;;  %p1967_p4 = scmp.lt.s32.totalorder %s1958_s24, %s1958_s24 }
  0x29   : > { %p1961_p0 = pnand %p1959_p13, %p2338_p8  ;;  %p1968_p7 = por %p1967_p4, %p1966_p5 }
  0x2b   : > { %p1962_p2 = pneg %p1961_p0 }
  0x2d   : > { %p1969_p9 = pnand %p1968_p7, %p1962_p2 }
  0x2f   : > { %1972 = shalt.err (!%p1969_p9)
}
  0x30   : > { %s2711_s25 = smov 256   ;;  %s2712_s26 = smov 16  }
  0x31   : > { %1852 = dma.hbm_to_vmem [thread:$0]  (!%p2324_p6), %s2739_s3, 4096, %s2313_s10, [#allocation9], %s2711_s25, %s2711_s25, %s2712_s26  }
  0x32   : > { %s2741_s5 = sld [smem:[#allocation27_spill]] }
  0x38   : > { %s1973_s18 = scalar_lea.hbm %s2741_s5, 4096 }
  0x39   : > { %p1974_p4 = scmp.ne.s32.totalorder %s2741_s5, %s1973_s18  ;;  %p1980_p12 = scmp.lt.u32.totalorder %s1973_s18, %s2741_s5 }
  0x3b   : > { %p1976_p10 = pnand %p1974_p4, %p2338_p8 }
  0x3d   : > { %p1977_p11 = pneg %p1976_p10 }
  0x3f   : > { %p1982_p13 = pnand %p1980_p12, %p1977_p11 }
  0x41   : > { %1985 = shalt.err (!%p1982_p13)
}
  0x42   : > { %s1986_s10 = scalar_lea.vmem %s2328_s14, 4096  ;;  %p1994_p7 = scmp.lt.s32.totalorder %s2328_s14, %s2328_s14 }
  0x43   : > { %p1987_p0 = scmp.ne.s32.totalorder %s2328_s14, %s1986_s10  ;;  %p1995_p9 = scmp.lt.s32.totalorder %s1986_s10, %s1986_s10 }
  0x45   : > { %p1989_p2 = pnand %p1987_p0, %p2338_p8  ;;  %p1996_p4 = por %p1995_p9, %p1994_p7 }
  0x47   : > { %p1990_p5 = pneg %p1989_p2 }
  0x49   : > { %p1997_p10 = pnand %p1996_p4, %p1990_p5 }
  0x4b   : > { %2000 = shalt.err (!%p1997_p10)
}
  0x4c   : > { %1858 = dma.hbm_to_vmem [thread:$0]  (!%p2324_p6), %s2741_s5, 4096, %s2328_s14, [#allocation12], %s2711_s25, %s2711_s25, %s2712_s26  }
  0x4d   : > { %s1490_s13 = sadd.s32 4294967294, %s2225_s30   ;;  %s2390_s16 = sadd.s32 1, %s2225_s30  }
  0x4e   : > { %2742 = sst [smem:[#allocation22_spill]] %s2390_s16  ;;  %s33_s17 = ssub.s32 %s2225_s30, %s2390_s16 }
  0x4f   : > { %s36_s18 = sadd.s32 1, %s2221_s29  ;;  %p34_p11 = scmp.eq.s32.totalorder %s33_s17, 0 }
  0x50   : > { %p43_p12 = scmp.ne.s32.totalorder %s2221_s29, %s2217_s28  ;;  %p44_p13 = scmp.eq.s32.totalorder %s2225_s30, 0 }
  0x51   : > { %p49_p0 = scmp.ne.s32.totalorder %s2217_s28, %s2213_s27  ;;  %p230_p7 = scmp.eq.s32.totalorder %s2308_s11, 1 }
  0x52   : > { %s2401_s19 = scalar_select %p34_p11, %s2221_s29, %s36_s18  }
  0x53   : > { %p45_p2 = por %p44_p13, %p43_p12  ;;  %p2405_p5 = por %p2716_p1, %p49_p0 }
  0x54   : > { %2743 = sst [smem:[#allocation23_spill]] %s2401_s19  ;;  %p236_p9 = scmp.eq.s32.totalorder %s1490_s13, 1 }
  0x55   : > { %s2744_s20 = scalar_select %p2405_p5, 1, 0 }
  0x56   : > { %p1880_p4 = scmp.lt.s32.totalorder %s2225_s30, 2  ;;  %s2412_s14 = sand.u32 1, %s2221_s29  }
  0x57   : > { %p2414_p10 = por %p230_p7, %p43_p12  ;;  %p2418_p3 = por %p236_p9, %p49_p0 }
  0x58   : > { %p2422_p11 = pnand %p1880_p4, %p45_p2  ;;  %s332_s24 = sand.u32 1, %s2225_s30  }
  0x59   : > { %s2745_s22 = scalar_select %p2414_p10, 1, 0 }
  0x5a   : > { %s2746_s23 = scalar_select %p2418_p3, 1, 0 }
  0x5b   : > { %s2748_s10 = scalar_select %p2422_p11, 1, 0 }
  0x5c   : > { %2747 = sst [smem:[#allocation24_spill]] %s2746_s23  ;;  %s2713_s9 = sshll.u32 %s2412_s14, 3 }
  0x5d   : > { %s2714_s13 = sshll.u32 %s2225_s30, 7  ;;  %s336_s17 = scalar_lea.vmem [#allocation5], %s2713_s9 }
  0x5e   : > { %s343_s18 = sshll.u32 %s336_s17, 4  ;;  %s2749_s1 = sld [smem:[#allocation25_spill]]  ;;  %s2438_s18 = int_to_ptr.vmem [resolvable:$true] %s343_s18 }
  0x5f   : > { %s2440_s5 = scalar_lea.sflag [#allocation6], %s332_s24  ;;  %p2446_p13 = pneg %p2422_p11 }
  0x64   : > { %s2436_s3 = scalar_lea.hbm %s2749_s1, %s2714_s13  ;;  %s2006_s17 = scalar_lea.hbm %s2749_s1, 256 }
  0x65   : > { %s2001_s19 = scalar_lea.hbm %s2436_s3, 128  ;;  %p2007_p7 = scmp.lt.u32.totalorder %s2436_s3, %s2749_s1 }
  0x66   : > { %p2002_p12 = scmp.ne.s32.totalorder %s2436_s3, %s2001_s19  ;;  %p2008_p9 = scmp.lt.u32.totalorder %s2006_s17, %s2001_s19 }
  0x67   : > { %p2010_p1 = scmp.lt.u32.totalorder %s2001_s19, %s2436_s3 }
  0x68   : > { %p2004_p0 = pnand %p2446_p13, %p2002_p12  ;;  %p2009_p4 = por %p2008_p9, %p2007_p7 }
  0x6a   : > { %p2005_p2 = pneg %p2004_p0  ;;  %p2011_p3 = por %p2010_p1, %p2009_p4 }
  0x6c   : > { %p2012_p10 = pnand %p2011_p3, %p2005_p2 }
  0x6e   : > { %2015 = shalt.err (!%p2012_p10)
}
  0x6f   : > { %s2016_s24 = scalar_lea.vmem %s2438_s18, 128  ;;  %s2231_s25 = smov [#allocation5]  }
  0x70   : > { %p2017_p12 = scmp.ne.s32.totalorder %s2438_s18, %s2016_s24  ;;  %s2021_s26 = sshll.u32 %s2231_s25, 4  ;;  %s2022_s26 = int_to_ptr.vmem [resolvable:$false] %s2021_s26 }
  0x71   : > { %s2023_s29 = scalar_lea.vmem %s2022_s26, 256  ;;  %p2024_p6 = scmp.lt.s32.totalorder %s2438_s18, %s2022_s26 }
  0x72   : > { %p2019_p0 = pnand %p2017_p12, %p2446_p13  ;;  %p2025_p8 = scmp.lt.s32.totalorder %s2023_s29, %s2016_s24 }
  0x74   : > { %p2020_p5 = pneg %p2019_p0  ;;  %p2026_p7 = por %p2025_p8, %p2024_p6 }
  0x76   : > { %p2027_p9 = pnand %p2026_p7, %p2020_p5 }
  0x78   : > { %2030 = shalt.err (!%p2027_p9)
}
  0x79   : > { %1868 = dma.hbm_to_vmem [thread:$0]  (!%p2422_p11), %s2436_s3, 128, %s2438_s18, %s2440_s5  }
  0x7a   : > { %s2751_s19 = sshll.u32 %s2225_s30, 7  ;;  %s2232_s1 = smov [#allocation10]  }
  0x7b   : > { %s2475_s25 = scalar_lea.hbm %s2703_s2, %s2751_s19  ;;  %s268_s26 = sshll.u32 %s2232_s1, 4  ;;  %s269_s26 = int_to_ptr.vmem [resolvable:$true] %s268_s26 }
  0x7c   : > { %s2233_s24 = smov [#allocation13]   ;;  %s2031_s27 = scalar_lea.hbm %s2705_s4, 4096 }
  0x7d   : > { %s294_s29 = sshll.u32 %s2233_s24, 4  ;;  %p2032_p1 = scmp.ne.s32.totalorder %s2705_s4, %s2031_s27  ;;  %s2477_s29 = int_to_ptr.vmem [resolvable:$true] %s294_s29 }
  0x7e   : > { %p2752_p3 = scmp.ne.s32.totalorder %s2740_s21, 0  ;;  %p2038_p5 = scmp.lt.u32.totalorder %s2031_s27, %s2705_s4 }
  0x80   : > { %p2034_p6 = pnand %p2032_p1, %p2752_p3 }
  0x82   : > { %p2035_p8 = pneg %p2034_p6 }
  0x84   : > { %p2040_p10 = pnand %p2038_p5, %p2035_p8 }
  0x86   : > { %2043 = shalt.err (!%p2040_p10)
}
  0x87   : > { %s2044_s1 = scalar_lea.vmem %s269_s26, 4096  ;;  %p2052_p0 = scmp.lt.s32.totalorder %s269_s26, %s269_s26 }
  0x88   : > { %p2045_p2 = scmp.ne.s32.totalorder %s269_s26, %s2044_s1  ;;  %p2053_p7 = scmp.lt.s32.totalorder %s2044_s1, %s2044_s1 }
  0x8a   : > { %p2047_p4 = pnand %p2045_p2, %p2752_p3  ;;  %p2054_p9 = por %p2053_p7, %p2052_p0 }
  0x8c   : > { %p2048_p12 = pneg %p2047_p4 }
  0x8e   : > { %p2055_p11 = pnand %p2054_p9, %p2048_p12 }
  0x90   : > { %2058 = shalt.err (!%p2055_p11)
}
  0x91   : > { %p2753_p1 = scmp.ne.s32.totalorder %s2738_s15, 0  ;;  %s2754_s7 = smov 16  }
  0x92   : > { %s2755_s8 = smov 256   ;;  %s2059_s13 = scalar_lea.hbm %s2707_s6, 4096 }
  0x93   : > { %1855 = dma.hbm_to_vmem [thread:$0]  (!%p2753_p1), %s2705_s4, 4096, %s269_s26, [#allocation9], %s2755_s8, %s2755_s8, %s2754_s7  }
  0x94   : > { %p2060_p6 = scmp.ne.s32.totalorder %s2707_s6, %s2059_s13  ;;  %p2066_p5 = scmp.lt.u32.totalorder %s2059_s13, %s2707_s6 }
  0x96   : > { %p2062_p11 = pnand %p2060_p6, %p2752_p3 }
  0x98   : > { %p2063_p8 = pneg %p2062_p11 }
  0x9a   : > { %p2068_p10 = pnand %p2066_p5, %p2063_p8 }
  0x9c   : > { %2071 = shalt.err (!%p2068_p10)
}
  0x9d   : > { %s2072_s26 = scalar_lea.vmem %s2477_s29, 4096  ;;  %p2080_p0 = scmp.lt.s32.totalorder %s2477_s29, %s2477_s29 }
  0x9e   : > { %p2073_p2 = scmp.ne.s32.totalorder %s2477_s29, %s2072_s26  ;;  %p2081_p7 = scmp.lt.s32.totalorder %s2072_s26, %s2072_s26 }
  0xa0   : > { %p2075_p4 = pnand %p2073_p2, %p2752_p3  ;;  %p2082_p9 = por %p2081_p7, %p2080_p0 }
  0xa2   : > { %p2076_p12 = pneg %p2075_p4 }
  0xa4   : > { %p2083_p6 = pnand %p2082_p9, %p2076_p12 }
  0xa6   : > { %2086 = shalt.err (!%p2083_p6)
}
  0xa7   : > { %s2234_s1 = smov 128   ;;  %s2235_s7 = smov 8  }
  0xa8   : > { %1861 = dma.hbm_to_vmem [thread:$0]  (!%p2753_p1), %s2707_s6, 4096, %s2477_s29, [#allocation12], %s2234_s1, %s2234_s1, %s2235_s7  }
  0xa9   : > { %s1497_s16 = sshll.u32 %s2412_s14, 4  ;;  %s1523_s27 = sshll.u32 %s2225_s30, 8 }
  0xaa   : > { %s2531_s13 = scalar_lea.hbm %s2701_s0, %s1523_s27  ;;  %s315_s17 = scalar_lea.vmem [#allocation2], %s1497_s16 }
  0xab   : > { %s322_s15 = sshll.u32 %s315_s17, 4  ;;  %s2756_s24 = sshll.u32 %s2412_s14, 3  ;;  %s2533_s15 = int_to_ptr.vmem [resolvable:$true] %s322_s15 }
  0xac   : > { %s2537_s3 = scalar_lea.vmem [#allocation7], %s2756_s24  ;;  %s312_s18 = scalar_lea.sflag [#allocation3], %s2412_s14 }
  0xad   : > { %s361_s29 = sshll.u32 %s2537_s3, 4  ;;  %s2087_s26 = scalar_lea.hbm %s2531_s13, 256  ;;  %s362_s29 = int_to_ptr.vmem [resolvable:$true] %s361_s29 }
  0xae   : > { %p2088_p3 = scmp.ne.s32.totalorder %s2531_s13, %s2087_s26  ;;  %s2092_s27 = scalar_lea.hbm %s2701_s0, 512 }
  0xaf   : > { %p2093_p8 = scmp.lt.u32.totalorder %s2531_s13, %s2701_s0  ;;  %p2094_p5 = scmp.lt.u32.totalorder %s2092_s27, %s2087_s26 }
  0xb0   : > { %p2090_p1 = pnand %p2088_p3, %p2446_p13  ;;  %p2096_p2 = scmp.lt.u32.totalorder %s2087_s26, %s2531_s13 }
  0xb1   : > { %p2095_p10 = por %p2094_p5, %p2093_p8 }
  0xb2   : > { %p2091_p11 = pneg %p2090_p1 }
  0xb3   : > { %p2097_p4 = por %p2096_p2, %p2095_p10 }
  0xb5   : > { %p2098_p12 = pnand %p2097_p4, %p2091_p11 }
  0xb7   : > { %2101 = shalt.err (!%p2098_p12)
}
  0xb8   : > { %s2102_s19 = scalar_lea.vmem %s2533_s15, 256  ;;  %s2236_s17 = smov [#allocation2]  }
  0xb9   : > { %p2103_p0 = scmp.ne.s32.totalorder %s2533_s15, %s2102_s19  ;;  %s2107_s24 = sshll.u32 %s2236_s17, 4  ;;  %s2108_s24 = int_to_ptr.vmem [resolvable:$false] %s2107_s24 }
  0xba   : > { %s2109_s21 = scalar_lea.vmem %s2108_s24, 512  ;;  %p2110_p6 = scmp.lt.s32.totalorder %s2533_s15, %s2108_s24 }
  0xbb   : > { %p2105_p7 = pnand %p2103_p0, %p2446_p13  ;;  %p2111_p3 = scmp.lt.s32.totalorder %s2109_s21, %s2102_s19 }
  0xbd   : > { %p2106_p9 = pneg %p2105_p7  ;;  %p2112_p1 = por %p2111_p3, %p2110_p6 }
  0xbf   : > { %p2113_p8 = pnand %p2112_p1, %p2106_p9 }
  0xc1   : > { %2116 = shalt.err (!%p2113_p8)
}
  0xc2   : > { %p2757_p11 = scmp.ne.s32.totalorder %s2748_s10, 0  ;;  %s2117_s26 = scalar_lea.hbm %s2475_s25, 128 }
  0xc3   : > { %p2118_p5 = scmp.ne.s32.totalorder %s2475_s25, %s2117_s26  ;;  %s2122_s14 = scalar_lea.hbm %s2703_s2, 256 }
  0xc4   : > { %1865 = dma.hbm_to_vmem [thread:$0]  (!%p2757_p11), %s2531_s13, 256, %s2533_s15, %s312_s18, %s2234_s1, %s2234_s1, %s2235_s7  }
  0xc5   : > { %p2120_p10 = pnand %p2118_p5, %p2446_p13  ;;  %p2123_p4 = scmp.lt.u32.totalorder %s2475_s25, %s2703_s2 }
  0xc6   : > { %p2124_p12 = scmp.lt.u32.totalorder %s2122_s14, %s2117_s26  ;;  %p2126_p7 = scmp.lt.u32.totalorder %s2117_s26, %s2475_s25 }
  0xc7   : > { %p2121_p2 = pneg %p2120_p10 }
  0xc8   : > { %p2125_p0 = por %p2124_p12, %p2123_p4 }
  0xca   : > { %p2127_p9 = por %p2126_p7, %p2125_p0 }
  0xcc   : > { %p2128_p6 = pnand %p2127_p9, %p2121_p2 }
  0xce   : > { %2131 = shalt.err (!%p2128_p6)
}
  0xcf   : > { %s2132_s1 = scalar_lea.vmem %s362_s29, 128  ;;  %s2237_s7 = smov [#allocation7]  }
  0xd0   : > { %p2133_p3 = scmp.ne.s32.totalorder %s362_s29, %s2132_s1  ;;  %s2137_s13 = sshll.u32 %s2237_s7, 4  ;;  %s2138_s13 = int_to_ptr.vmem [resolvable:$false] %s2137_s13 }
  0xd1   : > { %s2139_s15 = scalar_lea.vmem %s2138_s13, 256  ;;  %p2140_p5 = scmp.lt.s32.totalorder %s362_s29, %s2138_s13 }
  0xd2   : > { %p2135_p1 = pnand %p2133_p3, %p2446_p13  ;;  %p2141_p10 = scmp.lt.s32.totalorder %s2139_s15, %s2132_s1 }
  0xd4   : > { %p2136_p8 = pneg %p2135_p1  ;;  %p2142_p11 = por %p2141_p10, %p2140_p5 }
  0xd6   : > { %p2143_p4 = pnand %p2142_p11, %p2136_p8 }
  0xd8   : > { %2146 = shalt.err (!%p2143_p4)
}
  0xd9   : > { %p2758_p12 = scmp.ne.s32.totalorder %s2748_s10, 0  ;;  %p2759_p2 = scmp.ne.s32.totalorder %s2737_s12, 0 }
  0xda   : > { %s2590_s9 = sand.u32 (!%p2759_p2), 1, %s2217_s28   ;;  %p2760_p13 = scmp.ne.s32.totalorder (!%p2759_p2), %s2744_s20, 0 }
  0xdb   : > { %1871 = dma.hbm_to_vmem [thread:$0]  (!%p2758_p12), %s2475_s25, 128, %s362_s29, %s2440_s5  }
  0xdc   : > { %370 = sbr.rel (%p2759_p2) target bundleno = 1753 (0x6d9), region = 52  ;;  %s1505_s3 = sshll.u32 (!%p2759_p2), %s2590_s9, 4 }
  0xdd   : > { %s373_s18 = scalar_lea.sflag (!%p2759_p2), [#allocation3], %s2590_s9  ;;  %s2596_s19 = scalar_lea.vmem (!%p2759_p2), [#allocation2], %s1505_s3 }
  0xe3   : > { %2192 = dma.done.wait (%p2760_p13), %s373_s18, 256  }
  0xe4   : > { %2194 = vsyncadd (%p2760_p13), %s373_s18, 4294967040  ;;  %s381_s5 = sand.u32 1, %s2308_s11   ;;  %s1506_s12 = sshll.u32 %s2590_s9, 3 }
  0xe5   : > { %s382_s10 = scalar_lea.sflag [#allocation6], %s381_s5  ;;  %s2604_s25 = scalar_lea.vmem [#allocation5], %s1506_s12 }
  0xe6   : > { %2196 = dma.done.wait (%p2760_p13), %s382_s10, 256  }
  0xe7   : > { %2198 = vsyncadd (%p2760_p13), %s382_s10, 4294967040  ;;  %s2610_s29 = scalar_lea.vmem [#allocation7], %s1506_s12  ;;  %p2761_p11 = scmp.eq.s32.totalorder %s2308_s11, 0 }
  0xe9   : > { %2200 = dma.done.wait (%p2761_p11), [#allocation9], 8192   ;;  %p2762_p0 = pmov %p2761_p11 }
  0xeb   : > { %2202 = vsyncadd (%p2762_p0), [#allocation9], 4294959104  ;;  %p2763_p7 = pmov %p2762_p0 }
  0xec   : > { %p2764_p9 = pmov %p2762_p0 }
  0xed   : > { %2204 = dma.done.wait (%p2763_p7), [#allocation12], 8192  }
  0xee   : > { %2206 = vsyncadd (%p2764_p9), [#allocation12], 4294959104  ;;  %v2238_v0 = vmov 0.0   ;;  %v458_v1 = vld [vmem:[#allocation8 + $0x8] sm:$0xff]  ;;  %v460_v2 = vld [vmem:[#allocation8 + $0x18] sm:$0xff]  ;;  %vm847_vm0 = vcmask 64512  }
  0xef   : > { %553 = vmatprep.mubr.f32.mxu0 %v2238_v0  ;;  %v457_v3 = vld [vmem:[#allocation8] sm:$0xff]  ;;  %v1663_v4 = vpack.c.bf16 %v460_v2, %v458_v1  ;;  %v459_v5 = vld [vmem:[#allocation8 + $0x10] sm:$0xff]  ;;  %v462_v6 = vld [vmem:[#allocation8 + $0x28] sm:$0xff]  ;;  %s452_s20 = scalar_lea.vmem [#allocation14], %s1505_s3  ;;  %s2765_s26 = sld [smem:[#allocation28_spill]] }
  0xf0   : > { %v464_v7 = vld [vmem:[#allocation8 + $0x38] sm:$0xff]  ;;  %v1665_v8 = vpack.c.bf16 %v459_v5, %v457_v3  ;;  %v461_v10 = vld [vmem:[#allocation8 + $0x20] sm:$0xff]  ;;  %v463_v11 = vld [vmem:[#allocation8 + $0x30] sm:$0xff]  ;;  %s1336_s17 = sshll.u32 %s452_s20, 4  ;;  %s1524_s8 = sshll.u32 %s2308_s11, 8  ;;  %s2652_s17 = int_to_ptr.vmem [resolvable:$true] %s1336_s17 }
  0xf1   : > { %v1667_v9 = vpack.c.bf16 %v464_v7, %v462_v6  ;;  %v466_v12 = vld [vmem:[#allocation8 + $0x48] sm:$0xff]  ;;  %1664 = vmatprep.subr.bf16.mxu0 %v1663_v4  ;;  %v468_v13 = vld [vmem:[#allocation8 + $0x58] sm:$0xff]  ;;  %v1669_v14 = vpack.c.bf16 %v463_v11, %v461_v10  ;;  %v465_v16 = vld [vmem:[#allocation8 + $0x40] sm:$0xff]  ;;  %s2766_s23 = sld [smem:[#allocation29_spill]]  ;;  %s1323_s1 = scalar_lea.sflag [#allocation4], %s2590_s9 }
  0xf2   : > { %1666 = vmatpush1.bf16.msra.mxu0 %v1665_v8  ;;  %v1671_v15 = vpack.c.bf16 %v468_v13, %v466_v12  ;;  %v467_v17 = vld [vmem:[#allocation8 + $0x50] sm:$0xff]  ;;  %v470_v18 = vld [vmem:[#allocation8 + $0x68] sm:$0xff]  ;;  %v472_v19 = vld [vmem:[#allocation8 + $0x78] sm:$0xff]  ;;  %s2147_s7 = scalar_lea.vmem %s2652_s17, 256  ;;  %p2767_p3 = scmp.ne.s32.totalorder %s2745_s22, 0 }
  0xf3   : > { %1668 = vmatprep.subr.bf16.mxu0 %v1667_v9  ;;  %v1673_v20 = vpack.c.bf16 %v467_v17, %v465_v16  ;;  %v1675_v21 = vpack.c.bf16 %v472_v19, %v470_v18  ;;  %v469_v22 = vld [vmem:[#allocation8 + $0x60] sm:$0xff]  ;;  %v471_v23 = vld [vmem:[#allocation8 + $0x70] sm:$0xff]  ;;  %v474_v24 = vld [vmem:[#allocation8 + $0x88] sm:$0xff]  ;;  %p2148_p6 = scmp.ne.s32.totalorder %s2652_s17, %s2147_s7  ;;  %s2239_s11 = smov [#allocation14]  }
  0xf4   : > { %v476_v25 = vld [vmem:[#allocation8 + $0x98] sm:$0xff]  ;;  %v1677_v26 = vpack.c.bf16 %v471_v23, %v469_v22  ;;  %v473_v28 = vld [vmem:[#allocation8 + $0x80] sm:$0xff]  ;;  %v475_v29 = vld [vmem:[#allocation8 + $0x90] sm:$0xff]  ;;  %s2151_s13 = sshll.u32 %s2239_s11, 4  ;;  %s2152_s13 = int_to_ptr.vmem [resolvable:$false] %s2151_s13 }
  0xf5   : > { %v1679_v27 = vpack.c.bf16 %v476_v25, %v474_v24  ;;  %v478_v30 = vld [vmem:[#allocation8 + $0xa8] sm:$0xff]  ;;  %v480_v31 = vld [vmem:[#allocation8 + $0xb8] sm:$0xff]  ;;  %v1681_v32 = vpack.c.bf16 %v475_v29, %v473_v28  ;;  %v477_v34 = vld [vmem:[#allocation8 + $0xa0] sm:$0xff]  ;;  %p2149_p1 = pnand %p2148_p6, %p2767_p3  ;;  %s2153_s15 = scalar_lea.vmem %s2152_s13, 512 }
  0xf6   : > { %1670 = vmatpush1.bf16.msra.mxu0 %v1669_v14  ;;  %v1683_v33 = vpack.c.bf16 %v480_v31, %v478_v30  ;;  %v479_v35 = vld [vmem:[#allocation8 + $0xb0] sm:$0xff]  ;;  %v482_v36 = vld [vmem:[#allocation8 + $0xc8] sm:$0xff]  ;;  %v484_v37 = vld [vmem:[#allocation8 + $0xd8] sm:$0xff]  ;;  %p2154_p5 = scmp.lt.s32.totalorder %s2652_s17, %s2152_s13  ;;  %p2155_p10 = scmp.lt.s32.totalorder %s2153_s15, %s2147_s7 }
  0xf7   : > { %1672 = vmatprep.subr.bf16.mxu0 %v1671_v15  ;;  %v1685_v38 = vpack.c.bf16 %v479_v35, %v477_v34  ;;  %v1687_v39 = vpack.c.bf16 %v484_v37, %v482_v36  ;;  %v481_v40 = vld [vmem:[#allocation8 + $0xc0] sm:$0xff]  ;;  %v483_v41 = vld [vmem:[#allocation8 + $0xd0] sm:$0xff]  ;;  %v486_v42 = vld [vmem:[#allocation8 + $0xe8] sm:$0xff]  ;;  %s2657_s16 = scalar_lea.hbm %s2766_s23, %s1524_s8  ;;  %p2150_p8 = pneg %p2149_p1 }
  0xf8   : > { %v488_v43 = vld [vmem:[#allocation8 + $0xf8] sm:$0xff]  ;;  %v1689_v44 = vpack.c.bf16 %v483_v41, %v481_v40  ;;  %v485_v46 = vld [vmem:[#allocation8 + $0xe0] sm:$0xff]  ;;  %v487_v47 = vld [vmem:[#allocation8 + $0xf0] sm:$0xff]  ;;  %p2156_p4 = por %p2155_p10, %p2154_p5 }
  0xf9   : > { %v1691_v45 = vpack.c.bf16 %v488_v43, %v486_v42  ;;  %v567_v48 = vld [vmem:[#allocation10 + $0x8] sm:$0xff]  ;;  %v569_v49 = vld [vmem:[#allocation10 + $0x18] sm:$0xff]  ;;  %v1693_v50 = vpack.c.bf16 %v487_v47, %v485_v46  ;;  %v566_v52 = vld [vmem:[#allocation10] sm:$0xff] }
  0xfa   : > { %1674 = vmatpush1.bf16.msra.mxu0 %v1673_v20  ;;  %v1695_v51 = vpack.c.bf16 %v569_v49, %v567_v48  ;;  %v568_v53 = vld [vmem:[#allocation10 + $0x10] sm:$0xff]  ;;  %v571_v54 = vld [vmem:[#allocation10 + $0x28] sm:$0xff]  ;;  %v573_v55 = vld [vmem:[#allocation10 + $0x38] sm:$0xff]  ;;  %p2157_p12 = pnand %p2156_p4, %p2150_p8 }
  0xfb   : > { %1676 = vmatprep.subr.bf16.mxu0 %v1675_v21  ;;  %v453_v56 = vld [vmem:[%s2596_s19] sm:$0xff]  ;;  %v1697_v57 = vpack.c.bf16 %v568_v53, %v566_v52  ;;  %v1699_v58 = vpack.c.bf16 %v573_v55, %v571_v54  ;;  %v575_v61 = vld [vmem:[#allocation10 + $0x48] sm:$0xff]  ;;  %v577_v62 = vld [vmem:[#allocation10 + $0x58] sm:$0xff] }
  0xfc   : > { %v570_v59 = vld [vmem:[#allocation10 + $0x20] sm:$0xff]  ;;  %v572_v60 = vld [vmem:[#allocation10 + $0x30] sm:$0xff]  ;;  %v454_v1 = vld [vmem:[%s2596_s19 + $0x8] sm:$0xff]  ;;  %v1703_v2 = vpack.c.bf16 %v577_v62, %v575_v61 }
  0xfd   : > { %v1701_v63 = vpack.c.bf16 %v572_v60, %v570_v59  ;;  %v574_v3 = vld [vmem:[#allocation10 + $0x40] sm:$0xff]  ;;  %v576_v4 = vld [vmem:[#allocation10 + $0x50] sm:$0xff]  ;;  %v579_v5 = vld [vmem:[#allocation10 + $0x68] sm:$0xff] }
  0xfe   : > { %1678 = vmatpush1.bf16.msra.mxu0 %v1677_v26  ;;  %v581_v6 = vld [vmem:[#allocation10 + $0x78] sm:$0xff]  ;;  %v1705_v7 = vpack.c.bf16 %v576_v4, %v574_v3  ;;  %v578_v9 = vld [vmem:[#allocation10 + $0x60] sm:$0xff]  ;;  %v580_v10 = vld [vmem:[#allocation10 + $0x70] sm:$0xff] }
  0xff   : > { %1680 = vmatprep.subr.bf16.mxu0 %v1679_v27  ;;  %v1707_v8 = vpack.c.bf16 %v581_v6, %v579_v5  ;;  %v583_v11 = vld [vmem:[#allocation10 + $0x88] sm:$0xff]  ;;  %v585_v12 = vld [vmem:[#allocation10 + $0x98] sm:$0xff]  ;;  %v1709_v13 = vpack.c.bf16 %v580_v10, %v578_v9  ;;  %v582_v15 = vld [vmem:[#allocation10 + $0x80] sm:$0xff] }
 0x100   : > { %v1711_v14 = vpack.c.bf16 %v585_v12, %v583_v11  ;;  %v584_v16 = vld [vmem:[#allocation10 + $0x90] sm:$0xff]  ;;  %v587_v17 = vld [vmem:[#allocation10 + $0xa8] sm:$0xff]  ;;  %v589_v18 = vld [vmem:[#allocation10 + $0xb8] sm:$0xff] }
 0x101   : > { %v1713_v19 = vpack.c.bf16 %v584_v16, %v582_v15  ;;  %v1715_v20 = vpack.c.bf16 %v589_v18, %v587_v17  ;;  %v586_v21 = vld [vmem:[#allocation10 + $0xa0] sm:$0xff]  ;;  %v588_v22 = vld [vmem:[#allocation10 + $0xb0] sm:$0xff]  ;;  %v591_v23 = vld [vmem:[#allocation10 + $0xc8] sm:$0xff] }
 0x102   : > { %1682 = vmatpush1.bf16.msra.mxu0 %v1681_v32  ;;  %v593_v24 = vld [vmem:[#allocation10 + $0xd8] sm:$0xff]  ;;  %v1717_v25 = vpack.c.bf16 %v588_v22, %v586_v21  ;;  %v590_v27 = vld [vmem:[#allocation10 + $0xc0] sm:$0xff]  ;;  %v592_v28 = vld [vmem:[#allocation10 + $0xd0] sm:$0xff] }
 0x103   : > { %1684 = vmatprep.subr.bf16.mxu0 %v1683_v33  ;;  %v1719_v26 = vpack.c.bf16 %v593_v24, %v591_v23  ;;  %v595_v29 = vld [vmem:[#allocation10 + $0xe8] sm:$0xff]  ;;  %v597_v30 = vld [vmem:[#allocation10 + $0xf8] sm:$0xff]  ;;  %v1721_v31 = vpack.c.bf16 %v592_v28, %v590_v27  ;;  %v594_v33 = vld [vmem:[#allocation10 + $0xe0] sm:$0xff] }
 0x104   : > { %v1723_v32 = vpack.c.bf16 %v597_v30, %v595_v29  ;;  %v596_v34 = vld [vmem:[#allocation10 + $0xf0] sm:$0xff]  ;;  %v670_v35 = vld [vmem:[#allocation11 + $0x8] sm:$0xff]  ;;  %v672_v36 = vld [vmem:[#allocation11 + $0x18] sm:$0xff] }
 0x105   : > { %v1725_v37 = vpack.c.bf16 %v596_v34, %v594_v33  ;;  %v671_v40 = vld [vmem:[#allocation11 + $0x10] sm:$0xff]  ;;  %v674_v41 = vld [vmem:[#allocation11 + $0x28] sm:$0xff]  ;;  %v676_v42 = vld [vmem:[#allocation11 + $0x38] sm:$0xff] }
 0x106   : > { %1686 = vmatpush1.bf16.msra.mxu0 %v1685_v38  ;;  %v1727_v38 = vpack.c.bf16 %v672_v36, %v670_v35  ;;  %v455_v43 = vld [vmem:[%s2604_s25] sm:$0xff]  ;;  %v675_v47 = vld [vmem:[#allocation11 + $0x30] sm:$0xff]  ;;  %v680_v49 = vld [vmem:[#allocation11 + $0x58] sm:$0xff] }
 0x107   : > { %1688 = vmatprep.subr.bf16.mxu0 %v1687_v39  ;;  %v669_v39 = vld [vmem:[#allocation11] sm:$0xff]  ;;  %v678_v48 = vld [vmem:[#allocation11 + $0x48] sm:$0xff]  ;;  %v679_v53 = vld [vmem:[#allocation11 + $0x50] sm:$0xff] }
 0x108   : > { %v673_v46 = vld [vmem:[#allocation11 + $0x20] sm:$0xff]  ;;  %v682_v54 = vld [vmem:[#allocation11 + $0x68] sm:$0xff]  ;;  %v684_v55 = vld [vmem:[#allocation11 + $0x78] sm:$0xff] }
 0x109   : > { %v677_v52 = vld [vmem:[#allocation11 + $0x40] sm:$0xff]  ;;  %v683_v59 = vld [vmem:[#allocation11 + $0x70] sm:$0xff]  ;;  %v686_v60 = vld [vmem:[#allocation11 + $0x88] sm:$0xff] }
 0x10a   : > { %1690 = vmatpush1.bf16.msra.mxu0 %v1689_v44  ;;  %v1729_v44 = vpack.c.bf16 %v671_v40, %v669_v39  ;;  %v688_v61 = vld [vmem:[#allocation11 + $0x98] sm:$0xff]  ;;  %v689_v6 = vld [vmem:[#allocation11 + $0xa0] sm:$0xff] }
 0x10b   : > { %1692 = vmatprep.subr.bf16.mxu0 %v1691_v45  ;;  %v1731_v45 = vpack.c.bf16 %v676_v42, %v674_v41  ;;  %v692_v3 = vld [vmem:[#allocation11 + $0xb8] sm:$0xff]  ;;  %v693_v12 = vld [vmem:[#allocation11 + $0xc0] sm:$0xff] }
 0x10c   : > { %v696_v9 = vld [vmem:[#allocation11 + $0xd8] sm:$0xff]  ;;  %v697_v18 = vld [vmem:[#allocation11 + $0xe0] sm:$0xff] }
 0x10d   : > { %v700_v15 = vld [vmem:[#allocation11 + $0xf8] sm:$0xff] }
 0x10e   : > { %1694 = vmatpush1.bf16.msra.mxu0 %v1693_v50  ;;  %v1733_v50 = vpack.c.bf16 %v675_v47, %v673_v46  ;;  %v456_v21 = vld [vmem:[%s2610_s29] sm:$0xff] }
 0x10f   : > { %1696 = vmatprep.subr.bf16.mxu0 %v1695_v51  ;;  %v1735_v51 = vpack.c.bf16 %v680_v49, %v678_v48 }
 0x111   : > { %554 = vmatmul.mubr.f32.vlgmr.msra.gmra.mrb[0].mxu0 %v453_v56  ;;  %v1737_v56 = vpack.c.bf16 %v679_v53, %v677_v52 }
 0x112   : > { %1698 = vmatpush1.bf16.msra.mxu0 %v1697_v57  ;;  %559 = vmatprep.mubr.f32.mxu0 %v2238_v0  ;;  %v1739_v57 = vpack.c.bf16 %v684_v55, %v682_v54 }
 0x113   : > { %1700 = vmatprep.subr.bf16.mxu0 %v1699_v58  ;;  %v681_v58 = vld [vmem:[#allocation11 + $0x60] sm:$0xff] }
 0x114   : > { %v1741_v62 = vpack.c.bf16 %v683_v59, %v681_v58 }
 0x115   : > { %560 = vmatmul.mubr.f32.gmra.mrb[2].mxu0 %v454_v1  ;;  %v685_v1 = vld [vmem:[#allocation11 + $0x80] sm:$0xff] }
 0x116   : > { %1702 = vmatpush1.bf16.msra.mxu0 %v1701_v63  ;;  %662 = vmatprep.mubr.f32.mxu0 %v2238_v0  ;;  %v1743_v63 = vpack.c.bf16 %v688_v61, %v686_v60  ;;  %v1145_v60 = vld [vmem:[#allocation13 + $0x80] sm:$0xff]  ;;  %v1146_v61 = vld [vmem:[#allocation13 + $0x88] sm:$0xff] }
 0x117   : > { %1704 = vmatprep.subr.bf16.mxu0 %v1703_v2  ;;  %v690_v2 = vld [vmem:[#allocation11 + $0xa8] sm:$0xff] }
 0x118   : > { %v1747_v5 = vpack.c.bf16 %v692_v3, %v690_v2  ;;  %v1149_v2 = vld [vmem:[#allocation13 + $0xa0] sm:$0xff]  ;;  %v1150_v3 = vld [vmem:[#allocation13 + $0xa8] sm:$0xff] }
 0x11a   : > { %1706 = vmatpush1.bf16.msra.mxu0 %v1705_v7  ;;  %v691_v7 = vld [vmem:[#allocation11 + $0xb0] sm:$0xff] }
 0x11b   : > { %1708 = vmatprep.subr.bf16.mxu0 %v1707_v8  ;;  %v694_v8 = vld [vmem:[#allocation11 + $0xc8] sm:$0xff]  ;;  %v1749_v10 = vpack.c.bf16 %v691_v7, %v689_v6  ;;  %v1152_v6 = vld [vmem:[#allocation13 + $0xb8] sm:$0xff] }
 0x11c   : > { %v1751_v11 = vpack.c.bf16 %v696_v9, %v694_v8  ;;  %v1153_v8 = vld [vmem:[#allocation13 + $0xc0] sm:$0xff]  ;;  %v1154_v9 = vld [vmem:[#allocation13 + $0xc8] sm:$0xff] }
 0x11e   : > { %1710 = vmatpush1.bf16.msra.mxu0 %v1709_v13  ;;  %v695_v13 = vld [vmem:[#allocation11 + $0xd0] sm:$0xff] }
 0x11f   : > { %1712 = vmatprep.subr.bf16.mxu0 %v1711_v14  ;;  %v698_v14 = vld [vmem:[#allocation11 + $0xe8] sm:$0xff]  ;;  %v1753_v16 = vpack.c.bf16 %v695_v13, %v693_v12  ;;  %v1156_v12 = vld [vmem:[#allocation13 + $0xd8] sm:$0xff] }
 0x120   : > { %v1755_v17 = vpack.c.bf16 %v700_v15, %v698_v14  ;;  %v1157_v14 = vld [vmem:[#allocation13 + $0xe0] sm:$0xff]  ;;  %v1158_v15 = vld [vmem:[#allocation13 + $0xe8] sm:$0xff] }
 0x122   : > { %1714 = vmatpush1.bf16.msra.mxu0 %v1713_v19  ;;  %v699_v19 = vld [vmem:[#allocation11 + $0xf0] sm:$0xff] }
 0x123   : > { %1716 = vmatprep.subr.bf16.mxu0 %v1715_v20  ;;  %v1757_v20 = vpack.c.bf16 %v699_v19, %v697_v18  ;;  %v1160_v18 = vld [vmem:[#allocation13 + $0xf8] sm:$0xff] }
 0x126   : > { %1718 = vmatpush1.bf16.msra.mxu0 %v1717_v25 }
 0x127   : > { %1720 = vmatprep.subr.bf16.mxu0 %v1719_v26 }
 0x12a   : > { %1722 = vmatpush1.bf16.msra.mxu0 %v1721_v31 }
 0x12b   : > { %1724 = vmatprep.subr.bf16.mxu0 %v1723_v32 }
 0x12e   : > { %1726 = vmatpush1.bf16.msra.mxu0 %v1725_v37 }
 0x12f   : > { %1728 = vmatprep.subr.bf16.mxu0 %v1727_v38 }
 0x131   : > { %663 = vmatmul.mubr.f32.vlgmr.msra.gmra.mrb[4].mxu0 %v455_v43 }
 0x132   : > { %1730 = vmatpush1.bf16.msra.mxu0 %v1729_v44  ;;  %765 = vmatprep.mubr.f32.mxu0 %v2238_v0  ;;  %v687_v0 = vld [vmem:[#allocation11 + $0x90] sm:$0xff] }
 0x133   : > { %1732 = vmatprep.subr.bf16.mxu0 %v1731_v45  ;;  %v1745_v4 = vpack.c.bf16 %v687_v0, %v685_v1  ;;  %v1148_v1 = vld [vmem:[#allocation13 + $0x98] sm:$0xff] }
 0x136   : > { %1734 = vmatpush1.bf16.msra.mxu0 %v1733_v50 }
 0x137   : > { %1736 = vmatprep.subr.bf16.mxu0 %v1735_v51 }
 0x13a   : > { %1738 = vmatpush1.bf16.msra.mxu0 %v1737_v56 }
 0x13b   : > { %1740 = vmatprep.subr.bf16.mxu0 %v1739_v57 }
 0x13e   : > { %1742 = vmatpush1.bf16.msra.mxu0 %v1741_v62  ;;  %v1147_v62 = vld [vmem:[#allocation13 + $0x90] sm:$0xff] }
 0x13f   : > { %1744 = vmatprep.subr.bf16.mxu0 %v1743_v63  ;;  %v1759_v63 = vpack.c.bf16 %v1146_v61, %v1145_v60  ;;  %v1763_v0 = vpack.c.bf16 %v1148_v1, %v1147_v62 }
 0x142   : > { %1746 = vmatpush1.bf16.msra.mxu0 %v1745_v4  ;;  %v1767_v4 = vpack.c.bf16 %v1150_v3, %v1149_v2 }
 0x143   : > { %1748 = vmatprep.subr.bf16.mxu0 %v1747_v5  ;;  %v1151_v5 = vld [vmem:[#allocation13 + $0xb0] sm:$0xff] }
 0x144   : > { %v1771_v7 = vpack.c.bf16 %v1152_v6, %v1151_v5 }
 0x146   : > { %1750 = vmatpush1.bf16.msra.mxu0 %v1749_v10  ;;  %v1775_v10 = vpack.c.bf16 %v1154_v9, %v1153_v8 }
 0x147   : > { %1752 = vmatprep.subr.bf16.mxu0 %v1751_v11  ;;  %v1155_v11 = vld [vmem:[#allocation13 + $0xd0] sm:$0xff] }
 0x148   : > { %v1779_v13 = vpack.c.bf16 %v1156_v12, %v1155_v11 }
 0x14a   : > { %1754 = vmatpush1.bf16.msra.mxu0 %v1753_v16  ;;  %v1783_v16 = vpack.c.bf16 %v1158_v15, %v1157_v14 }
 0x14b   : > { %1756 = vmatprep.subr.bf16.mxu0 %v1755_v17  ;;  %v1159_v17 = vld [vmem:[#allocation13 + $0xf0] sm:$0xff] }
 0x14c   : > { %v1787_v19 = vpack.c.bf16 %v1160_v18, %v1159_v17 }
 0x14e   : > { %1758 = vmatpush1.bf16.msra.mxu0 %v1757_v20  ;;  %v951_v20 = vld [vmem:[#allocation13] sm:$0xff] }
 0x151   : > { %766 = vmatmul.mubr.f32.vlgmr.msra.gmra.mrb[6].mxu0 %v456_v21  ;;  %v952_v21 = vld [vmem:[#allocation13 + $0x8] sm:$0xff] }
 0x1e4   : > { %v555_v22 = vpop.f32.mrb[0].mxu0 }
 0x1e5   : > { %v557_v23 = vpop.f32.mrb[1].mxu0  ;;  %1575 = vmatprep.mubr.f32.mxu1 %v555_v22  ;;  %v1791_v22 = vpack.c.bf16 %v952_v21, %v951_v20 }
 0x1e8   : > { %v561_v24 = vpop.f32.mrb[2].mxu0 }
 0x1e9   : > { %v563_v25 = vpop.f32.mrb[3].mxu0 }
 0x204   : > { %v664_v26 = vpop.f32.mrb[4].mxu0 }
 0x205   : > { %v666_v27 = vpop.f32.mrb[5].mxu0  ;;  %1573 = vmatprep.subr.mxu1 %v664_v26 }
 0x206   : > { %1574 = vmatpush3.xpose.msra.mxu1 %v664_v26 }
 0x209   : > { %1576 = vmatmul.mubr.f32.vlgmr.msra.gmra.mrb[0].mxu1 %v561_v24 }
 0x224   : > { %v767_v28 = vpop.f32.mrb[6].mxu0 }
 0x225   : > { %1578 = vmatprep.subr.mxu1 %v767_v28  ;;  %v769_v33 = vpop.f32.mrb[7].mxu0 }
 0x226   : > { %1579 = vmatpush3.msra.mxu1 %v767_v28  ;;  %v953_v28 = vld [vmem:[#allocation13 + $0x10] sm:$0xff] }
 0x227   : > { %1583 = vmatprep.subr.mxu1 %v666_v27 }
 0x2dc   : > { %v1577_v29 = vpop.f32.mrb[0].mxu1 }
 0x2dd   : > { %v838_v30 = vpop.f32.mrb[1].mxu1  ;;  %v851_v32 = vsel %vm847_vm0, %v1577_v29, -inf }
 0x2de   : > { %v848_v31 = vsel %vm847_vm0, %v838_v30, -inf }
 0x2df   : > { %849 = vmax.xlane.f32.xlu0 %v848_v31 }
 0x2e3   : > { %852 = vmax.xlane.f32.xlu0 %v851_v32 }
 0x36c   : > { %v850_v34 = vpop.xlane.xlu0 %849 }
 0x36d   : > { %v854_v35 = vsub.f32 %v838_v30, %v850_v34 }
 0x36f   : > { %v856_v36 = vmul.f32 1.442695, %v854_v35 }
 0x370   : > { %v853_v37 = vpop.xlane.xlu0 %852 }
 0x371   : > { %1929 = vpow2.f32 %v856_v36  ;;  %v855_v38 = vsub.f32 %v1577_v29, %v853_v37  ;;  %v954_v29 = vld [vmem:[#allocation13 + $0x18] sm:$0xff]  ;;  %v955_v37 = vld [vmem:[#allocation13 + $0x20] sm:$0xff] }
 0x372   : > { %v1795_v35 = vpack.c.bf16 %v954_v29, %v953_v28 }
 0x373   : > { %v858_v39 = vmul.f32 1.442695, %v855_v38  ;;  %v956_v38 = vld [vmem:[#allocation13 + $0x28] sm:$0xff] }
 0x375   : > { %1931 = vpow2.f32 %v858_v39  ;;  %v1799_v39 = vpack.c.bf16 %v956_v38, %v955_v37 }
 0x37b   : > { %v1930_v40 = vpop.eup %1929 }
 0x37c   : > { %1580 = vmatprep.mubr.msk.f32.mxu1 %vm847_vm0, %v1930_v40  ;;  %v860_v57 = vsel %vm847_vm0, %v1930_v40, 0.0  ;;  %v957_v40 = vld [vmem:[#allocation13 + $0x30] sm:$0xff] }
 0x37f   : > { %v1932_v41 = vpop.eup %1931 }
 0x380   : > { %1581 = vmatmul.mubr.msk.f32.vlgmr.msra.gmra.mrb[2].mxu1 %vm847_vm0, %v1932_v41  ;;  %v863_v59 = vsel %vm847_vm0, %v1932_v41, 0.0  ;;  %v958_v41 = vld [vmem:[#allocation13 + $0x38] sm:$0xff] }
 0x381   : > { %1584 = vmatpush3.xpose.msra.mxu1 %v666_v27  ;;  %1585 = vmatprep.mubr.f32.mxu1 %v557_v23 }
 0x382   : > { %1588 = vmatprep.subr.mxu1 %v769_v33 }
 0x384   : > { %1586 = vmatmul.mubr.f32.vlgmr.msra.gmra.mrb[4].mxu1 %v563_v25 }
 0x385   : > { %1589 = vmatpush3.msra.mxu1 %v769_v33 }
 0x386   : > { %1760 = vmatprep.subr.bf16.mxu1 %v1759_v63 }
 0x453   : > { %v2632_v42 = vpop.f32.mrb[2].mxu1 }
 0x454   : > { %v2634_v43 = vpop.f32.mrb[3].mxu1 }
 0x457   : > { %v1587_v44 = vpop.f32.mrb[4].mxu1 }
 0x458   : > { %v1033_v45 = vpop.f32.mrb[5].mxu1  ;;  %v1045_v47 = vsel %vm847_vm0, %v1587_v44, -inf }
 0x459   : > { %v1042_v46 = vsel %vm847_vm0, %v1033_v45, -inf }
 0x45a   : > { %1043 = vmax.xlane.f32.xlu1 %v1042_v46  ;;  %v960_v46 = vld [vmem:[#allocation13 + $0x48] sm:$0xff] }
 0x45e   : > { %1046 = vmax.xlane.f32.xlu1 %v1045_v47 }
 0x4e7   : > { %v1044_v48 = vpop.xlane.xlu1 %1043 }
 0x4e8   : > { %v1048_v49 = vsub.f32 %v1033_v45, %v1044_v48  ;;  %v959_v45 = vld [vmem:[#allocation13 + $0x40] sm:$0xff]  ;;  %v961_v48 = vld [vmem:[#allocation13 + $0x50] sm:$0xff] }
 0x4e9   : > { %v1807_v47 = vpack.c.bf16 %v960_v46, %v959_v45 }
 0x4ea   : > { %v1050_v50 = vmul.f32 1.442695, %v1048_v49  ;;  %v962_v49 = vld [vmem:[#allocation13 + $0x58] sm:$0xff] }
 0x4eb   : > { %v1047_v51 = vpop.xlane.xlu1 %1046 }
 0x4ec   : > { %1933 = vpow2.f32 %v1050_v50  ;;  %v1049_v52 = vsub.f32 %v1587_v44, %v1047_v51  ;;  %v1803_v44 = vpack.c.bf16 %v958_v41, %v957_v40  ;;  %v1811_v50 = vpack.c.bf16 %v962_v49, %v961_v48  ;;  %v963_v51 = vld [vmem:[#allocation13 + $0x60] sm:$0xff] }
 0x4ee   : > { %v1052_v53 = vmul.f32 1.442695, %v1049_v52  ;;  %v964_v52 = vld [vmem:[#allocation13 + $0x68] sm:$0xff] }
 0x4f0   : > { %1935 = vpow2.f32 %v1052_v53  ;;  %v1815_v53 = vpack.c.bf16 %v964_v52, %v963_v51 }
 0x4f6   : > { %v1934_v54 = vpop.eup %1933 }
 0x4f7   : > { %1590 = vmatprep.mubr.msk.f32.mxu1 %vm847_vm0, %v1934_v54  ;;  %v1054_v55 = vsel %vm847_vm0, %v1934_v54, 0.0  ;;  %v965_v54 = vld [vmem:[#allocation13 + $0x70] sm:$0xff] }
 0x4f8   : > { %1055 = vadd.xlane.f32.xlu0 %v1054_v55  ;;  %v966_v55 = vld [vmem:[#allocation13 + $0x78] sm:$0xff] }
 0x4fa   : > { %v1936_v56 = vpop.eup %1935 }
 0x4fb   : > { %1591 = vmatmul.mubr.msk.f32.vlgmr.msra.gmra.mrb[6].mxu1 %vm847_vm0, %v1936_v56  ;;  %v1057_v58 = vsel %vm847_vm0, %v1936_v56, 0.0  ;;  %v1819_v56 = vpack.c.bf16 %v966_v55, %v965_v54 }
 0x4fc   : > { %861 = vadd.xlane.f32.xlu0 %v860_v57  ;;  %1058 = vadd.xlane.f32.xlu1 %v1057_v58 }
 0x4fd   : > { %1762 = vmatpush3.bf16.msra.mxu1 %v1759_v63 }
 0x4fe   : > { %1764 = vmatprep.subr.bf16.mxu1 %v1763_v0 }
 0x500   : > { %864 = vadd.xlane.f32.xlu1 %v863_v59  ;;  %v1517_v59 = vld [vmem:[%s2765_s26] ss:$0 sm:$0xff] }
 0x501   : > { %1766 = vmatpush3.bf16.msra.mxu1 %v1763_v0 }
 0x502   : > { %1768 = vmatprep.subr.bf16.mxu1 %v1767_v4 }
 0x505   : > { %1770 = vmatpush3.bf16.msra.mxu1 %v1767_v4 }
 0x506   : > { %1772 = vmatprep.subr.bf16.mxu1 %v1771_v7 }
 0x509   : > { %1774 = vmatpush3.bf16.msra.mxu1 %v1771_v7 }
 0x50a   : > { %1776 = vmatprep.subr.bf16.mxu1 %v1775_v10 }
 0x50d   : > { %1778 = vmatpush3.bf16.msra.mxu1 %v1775_v10 }
 0x50e   : > { %1780 = vmatprep.subr.bf16.mxu1 %v1779_v13 }
 0x511   : > { %1782 = vmatpush3.bf16.msra.mxu1 %v1779_v13 }
 0x512   : > { %1784 = vmatprep.subr.bf16.mxu1 %v1783_v16 }
 0x515   : > { %1786 = vmatpush3.bf16.msra.mxu1 %v1783_v16 }
 0x516   : > { %1788 = vmatprep.subr.bf16.mxu1 %v1787_v19 }
 0x519   : > { %1790 = vmatpush3.bf16.msra.mxu1 %v1787_v19 }
 0x51a   : > { %1792 = vmatprep.subr.bf16.mxu1 %v1791_v22 }
 0x585   : > { %v1056_v23 = vpop.xlane.xlu0 %1055 }
 0x586   : > { %1937 = vrcp.f32 %v1056_v23 }
 0x589   : > { %v862_v24 = vpop.xlane.xlu0 %861  ;;  %v1059_v25 = vpop.xlane.xlu1 %1058 }
 0x58a   : > { %1939 = vrcp.f32 %v862_v24 }
 0x58b   : > { %1941 = vrcp.f32 %v1059_v25 }
 0x590   : > { %v1938_v26 = vpop.eup %1937 }
 0x594   : > { %v1940_v30 = vpop.eup %1939 }
 0x595   : > { %v1942_v32 = vpop.eup %1941  ;;  %v949_v36 = vmul.f32 %v1940_v30, %v2634_v43  ;;  %v865_v43 = vpop.xlane.xlu1 %864 }
 0x596   : > { %1943 = vrcp.f32 %v865_v43 }
 0x5a0   : > { %v1944_v57 = vpop.eup %1943 }
 0x5a1   : > { %v950_v58 = vmul.f32 %v1944_v57, %v2632_v42 }
 0x5ce   : > { %v1592_v27 = vpop.f32.mrb[6].mxu1 }
 0x5cf   : > { %v1132_v31 = vpop.f32.mrb[7].mxu1  ;;  %v1144_v34 = vmul.f32 %v1942_v32, %v1592_v27 }
 0x5d0   : > { %v1143_v33 = vmul.f32 %v1938_v26, %v1132_v31 }
 0x5d2   : > { %1625 = vmatprep.mubr.f32.mxu1 %v1143_v33 }
 0x5d3   : > { %1626 = vmatmul.mubr.f32.vlgmr.msra.gmra.mrb[8].mxu1 %v1144_v34 }
 0x5d4   : > { %1794 = vmatpush3.bf16.msra.mxu1 %v1791_v22  ;;  %1660 = vmatprep.mubr.f32.mxu1 %v949_v36 }
 0x5d5   : > { %1796 = vmatprep.subr.bf16.mxu1 %v1795_v35 }
 0x5d8   : > { %1798 = vmatpush3.bf16.msra.mxu1 %v1795_v35 }
 0x5d9   : > { %1800 = vmatprep.subr.bf16.mxu1 %v1799_v39 }
 0x5dc   : > { %1802 = vmatpush3.bf16.msra.mxu1 %v1799_v39 }
 0x5dd   : > { %1804 = vmatprep.subr.bf16.mxu1 %v1803_v44 }
 0x5e0   : > { %1806 = vmatpush3.bf16.msra.mxu1 %v1803_v44 }
 0x5e1   : > { %1808 = vmatprep.subr.bf16.mxu1 %v1807_v47 }
 0x5e4   : > { %1810 = vmatpush3.bf16.msra.mxu1 %v1807_v47 }
 0x5e5   : > { %1812 = vmatprep.subr.bf16.mxu1 %v1811_v50 }
 0x5e8   : > { %1814 = vmatpush3.bf16.msra.mxu1 %v1811_v50 }
 0x5e9   : > { %1816 = vmatprep.subr.bf16.mxu1 %v1815_v53 }
 0x5ec   : > { %1818 = vmatpush3.bf16.msra.mxu1 %v1815_v53 }
 0x5ed   : > { %1820 = vmatprep.subr.bf16.mxu1 %v1819_v56 }
 0x5f0   : > { %1822 = vmatpush3.bf16.msra.mxu1 %v1819_v56 }
 0x5f3   : > { %1661 = vmatmul.mubr.f32.vlgmr.msra.gmra.mrb[8].mxu1 %v950_v58 }
 0x6c6   : > { %v1662_v60 = vpop.f32.mrb[8].mxu1 }
 0x6c7   : > { %v1319_v61 = vadd.f32 %v1662_v60, %v1517_v59  ;;  %v1302_v62 = vpop.f32.mrb[9].mxu1 }
 0x6c8   : > { %v1318_v42 = vadd.f32 %v1517_v59, %v1302_v62 }
 0x6c9   : > { %1321 = vst [vmem:[%s452_s20 + $0x8] sm:$0xff] %v1319_v61 }
 0x6ca   : > { %1320 = vst [vmem:[%s452_s20] sm:$0xff] %v1318_v42 }
 0x6cb   : > { %2160 = shalt.err (!%p2157_p12)
}
 0x6cc   : > { %s2161_s3 = scalar_lea.hbm %s2657_s16, 256  ;;  %s2165_s5 = scalar_lea.hbm %s2766_s23, 512 }
 0x6cd   : > { %p2162_p2 = scmp.ne.s32.totalorder %s2657_s16, %s2161_s3  ;;  %p2166_p0 = scmp.lt.u32.totalorder %s2657_s16, %s2766_s23 }
 0x6ce   : > { %p2167_p7 = scmp.lt.u32.totalorder %s2165_s5, %s2161_s3  ;;  %p2169_p6 = scmp.lt.u32.totalorder %s2161_s3, %s2657_s16 }
 0x6cf   : > { %p2163_p13 = pnand %p2162_p2, %p2767_p3 }
 0x6d0   : > { %p2168_p9 = por %p2167_p7, %p2166_p0 }
 0x6d1   : > { %p2164_p11 = pneg %p2163_p13 }
 0x6d2   : > { %p2170_p1 = por %p2169_p6, %p2168_p9 }
 0x6d4   : > { %p2171_p8 = pnand %p2170_p1, %p2164_p11 }
 0x6d6   : > { %2174 = shalt.err (!%p2171_p8)
}
 0x6d7   : > { %s2240_s25 = smov 128   ;;  %s2241_s29 = smov 8  }
 0x6d8   : > { %1847 = dma.vmem_to_hbm [thread:$0]  (%p2767_p3), %s2652_s17, 256, %s2657_s16, %s1323_s1, %s2240_s25, %s2240_s25, %s2241_s29  }
 0x6d9 PF: > { %s2768_s20 = sld [smem:[#allocation20_spill]]  ;;  %s2769_s24 = sld [smem:[#allocation24_spill]] }
 0x6da   : > { %p2771_p10 = scmp.ge.s32.totalorder %s2225_s30, 2 }
 0x6df   : > { %s1351_s21 = sand.u32 1, %s2768_s20   ;;  %p2770_p5 = scmp.ne.s32.totalorder %s2769_s24, 0 }
 0x6e0   : > { %s1352_s26 = scalar_lea.sflag [#allocation4], %s1351_s21 }
 0x6e1   : > { %p1873_p4 = pnand %p2771_p10, %p2770_p5 }
 0x6e3   : > { %2208 = dma.done.wait (!%p1873_p4), %s1352_s26, 256  }
 0x6e4   : > { %2210 = vsyncadd (!%p1873_p4), %s1352_s26, 4294967040  ;;  %s2772_s30 = sld [smem:[#allocation22_spill]]  ;;  %s2773_s8 = sld [smem:[#allocation21_spill]] }
 0x6e5   : > { %s2774_s29 = sld [smem:[#allocation23_spill]]  ;;  %s2775_s27 = smov %s2217_s28 }
 0x6ea   : > { %p26_p12 = scmp.ge.s32.totalorder %s2772_s30, 4   ;;  %s2776_s28 = smov %s2773_s8 }
 0x6ec   :  { %28 = sbr.rel (!%p26_p12) target bundleno = 15 (0xf), region = 137 }
 0x6f3   :  { %1357 = vsyncpa [#allocation3], 1 }
 0x6f4   :  { %1359 = vsyncpa [#allocation3 + $0x1], 1 }
 0x6f5   :  { %1360 = vsyncpa [#allocation6], 1 }
 0x6f6   :  { %1362 = vsyncpa [#allocation6 + $0x1], 1 }
 0x6f7   :  { %1363 = vsyncpa [#allocation9], 1 }
 0x6f8   :  { %1364 = vsyncpa [#allocation12], 1 }
 0x6f9   :  { %1365 = vsyncpa [#allocation4], 1 }
 0x6fa   :  { %1367 = vsyncpa [#allocation4 + $0x1], 1 }

// kernel: tpu_custom_call.1
= control target key start
LH: loop header
LB: loop body
LE: loop exit
PB: predicated region body
PF: predicated region fallthrough
CT: control target
= control target key end

     0   :  { %s2701_s0 = inlined_call_operand.hbm [shape: f32[2,16,128], index: 0, kind: input, shape index: {}]   ;;  %s2702_s1 = inlined_call_operand.hbm [shape: f32[2,8,128], index: 1, kind: input, shape index: {}]   ;;  %s2703_s2 = inlined_call_operand.hbm [shape: f32[2,8,128], index: 2, kind: input, shape index: {}]   ;;  %s2704_s3 = inlined_call_operand.hbm [shape: f32[128,256], index: 3, kind: input, shape index: {}]   ;;  %s2705_s4 = inlined_call_operand.hbm [shape: f32[128,256], index: 4, kind: input, shape index: {}]   ;;  %s2706_s5 = inlined_call_operand.hbm [shape: f32[128,256], index: 5, kind: input, shape index: {}]   ;;  %s2707_s6 = inlined_call_operand.hbm [shape: f32[256,128], index: 6, kind: input, shape index: {}]   ;;  %s2708_s7 = inlined_call_operand.vmem [shape: f32[1,128], index: 7, kind: input, shape index: {}]   ;;  %s2709_s8 = inlined_call_operand.hbm [shape: f32[2,16,128], index: 8, kind: output, shape index: {}]  }
   0x1   :  { %2730 = sst [smem:[#allocation25_spill]] %s2702_s1 }
   0x2   :  { %2731 = sst [smem:[#allocation26_spill]] %s2704_s3 }
   0x3   :  { %2732 = sst [smem:[#allocation27_spill]] %s2706_s5 }
   0x4   :  { %2733 = sst [smem:[#allocation28_spill]] %s2708_s7 }
   0x5   :  { %2734 = sst [smem:[#allocation29_spill]] %s2709_s8 }
   0x6   :  { %13 = vsyncpa [#allocation3], 0 }
   0x7   :  { %15 = vsyncpa [#allocation3 + $0x1], 0 }
   0x8   :  { %16 = vsyncpa [#allocation6], 0 }
   0x9   :  { %18 = vsyncpa [#allocation6 + $0x1], 0 }
   0xa   :  { %19 = vsyncpa [#allocation9], 0 }
   0xb   :  { %20 = vsyncpa [#allocation12], 0 }
   0xc   :  { %21 = vsyncpa [#allocation4], 0 }
   0xd   :  { %23 = vsyncpa [#allocation4 + $0x1], 0  ;;  %s2287_s27 = smov 0   ;;  %s2289_s28 = smov 0  }
   0xe   :  { %s2291_s29 = smov 0   ;;  %s2293_s30 = smov 0  }
   0xf LB: > { %2735 = sst [smem:[#allocation20_spill]] %s2213_s27  ;;  %s2227_s9 = smov [#allocation8]   ;;  %s2225_s30 = sphi %s2293_s30, %s2772_s30   ;;  %s2221_s29 = sphi %s2291_s29, %s2774_s29   ;;  %s2217_s28 = sphi %s2289_s28, %s2776_s28   ;;  %s2213_s27 = sphi %s2287_s27, %s2775_s27  }
  0x10   : > { %2736 = sst [smem:[#allocation21_spill]] %s2221_s29  ;;  %s255_s10 = sshll.u32 %s2227_s9, 4  ;;  %s2313_s10 = int_to_ptr.vmem [resolvable:$true] %s255_s10 }
  0x11   : > { %s2308_s11 = sadd.s32 4294967295, %s2225_s30   ;;  %p1491_p0 = scmp.ge.s32.totalorder %s2225_s30, 1 }
  0x12   : > { %p2716_p1 = scmp.eq.s32.totalorder %s2308_s11, 0  ;;  %p243_p2 = scmp.lt.s32.totalorder %s2225_s30, 3 }
  0x13   : > { %s2228_s13 = smov [#allocation11]   ;;  %s2739_s3 = sld [smem:[#allocation26_spill]] }
  0x14   : > { %p2315_p3 = pnand %p1491_p0, %p243_p2  ;;  %s281_s14 = sshll.u32 %s2228_s13, 4  ;;  %s2328_s14 = int_to_ptr.vmem [resolvable:$true] %s281_s14 }
  0x16   : > { %s2737_s12 = scalar_select %p2315_p3, 1, 0 }
  0x17   : > { %p1849_p5 = pneg %p2315_p3 }
  0x19   : > { %p2324_p6 = pnand %p1849_p5, %p2716_p1  ;;  %s1945_s18 = scalar_lea.hbm %s2739_s3, 4096 }
  0x1a   : > { %p1946_p7 = scmp.ne.s32.totalorder %s2739_s3, %s1945_s18  ;;  %p1952_p11 = scmp.lt.u32.totalorder %s1945_s18, %s2739_s3 }
  0x1b   : > { %s2738_s15 = scalar_select %p2324_p6, 1, 0 }
  0x1c   : > { %p2338_p8 = pneg %p2324_p6 }
  0x1e   : > { %s2740_s21 = scalar_select %p2338_p8, 1, 0 }
  0x1f   : > { %p1948_p9 = pnand %p2338_p8, %p1946_p7 }
  0x21   : > { %p1949_p10 = pneg %p1948_p9 }
  0x23   : > { %p1954_p12 = pnand %p1952_p11, %p1949_p10 }
  0x25   : > { %1957 = shalt.err (!%p1954_p12)
}
  0x26   : > { %s1958_s24 = scalar_lea.vmem %s2313_s10, 4096  ;;  %p1966_p5 = scmp.lt.s32.totalorder %s2313_s10, %s2313_s10 }
  0x27   : > { %p1959_p13 = scmp.ne.s32.totalorder %s2313_s10, %s1958_s24  ;;  %p1967_p4 = scmp.lt.s32.totalorder %s1958_s24, %s1958_s24 }
  0x29   : > { %p1961_p0 = pnand %p1959_p13, %p2338_p8  ;;  %p1968_p7 = por %p1967_p4, %p1966_p5 }
  0x2b   : > { %p1962_p2 = pneg %p1961_p0 }
  0x2d   : > { %p1969_p9 = pnand %p1968_p7, %p1962_p2 }
  0x2f   : > { %1972 = shalt.err (!%p1969_p9)
}
  0x30   : > { %s2711_s25 = smov 256   ;;  %s2712_s26 = smov 16  }
  0x31   : > { %1852 = dma.hbm_to_vmem [thread:$0]  (!%p2324_p6), %s2739_s3, 4096, %s2313_s10, [#allocation9], %s2711_s25, %s2711_s25, %s2712_s26  }
  0x32   : > { %s2741_s5 = sld [smem:[#allocation27_spill]] }
  0x38   : > { %s1973_s18 = scalar_lea.hbm %s2741_s5, 4096 }
  0x39   : > { %p1974_p4 = scmp.ne.s32.totalorder %s2741_s5, %s1973_s18  ;;  %p1980_p12 = scmp.lt.u32.totalorder %s1973_s18, %s2741_s5 }
  0x3b   : > { %p1976_p10 = pnand %p1974_p4, %p2338_p8 }
  0x3d   : > { %p1977_p11 = pneg %p1976_p10 }
  0x3f   : > { %p1982_p13 = pnand %p1980_p12, %p1977_p11 }
  0x41   : > { %1985 = shalt.err (!%p1982_p13)
}
  0x42   : > { %s1986_s10 = scalar_lea.vmem %s2328_s14, 4096  ;;  %p1994_p7 = scmp.lt.s32.totalorder %s2328_s14, %s2328_s14 }
  0x43   : > { %p1987_p0 = scmp.ne.s32.totalorder %s2328_s14, %s1986_s10  ;;  %p1995_p9 = scmp.lt.s32.totalorder %s1986_s10, %s1986_s10 }
  0x45   : > { %p1989_p2 = pnand %p1987_p0, %p2338_p8  ;;  %p1996_p4 = por %p1995_p9, %p1994_p7 }
  0x47   : > { %p1990_p5 = pneg %p1989_p2 }
  0x49   : > { %p1997_p10 = pnand %p1996_p4, %p1990_p5 }
  0x4b   : > { %2000 = shalt.err (!%p1997_p10)
}
  0x4c   : > { %1858 = dma.hbm_to_vmem [thread:$0]  (!%p2324_p6), %s2741_s5, 4096, %s2328_s14, [#allocation12], %s2711_s25, %s2711_s25, %s2712_s26  }
  0x4d   : > { %s1490_s13 = sadd.s32 4294967294, %s2225_s30   ;;  %s2390_s16 = sadd.s32 1, %s2225_s30  }
  0x4e   : > { %2742 = sst [smem:[#allocation22_spill]] %s2390_s16  ;;  %s33_s17 = ssub.s32 %s2225_s30, %s2390_s16 }
  0x4f   : > { %s36_s18 = sadd.s32 1, %s2221_s29  ;;  %p34_p11 = scmp.eq.s32.totalorder %s33_s17, 0 }
  0x50   : > { %p43_p12 = scmp.ne.s32.totalorder %s2221_s29, %s2217_s28  ;;  %p44_p13 = scmp.eq.s32.totalorder %s2225_s30, 0 }
  0x51   : > { %p49_p0 = scmp.ne.s32.totalorder %s2217_s28, %s2213_s27  ;;  %p230_p7 = scmp.eq.s32.totalorder %s2308_s11, 1 }
  0x52   : > { %s2401_s19 = scalar_select %p34_p11, %s2221_s29, %s36_s18  }
  0x53   : > { %p45_p2 = por %p44_p13, %p43_p12  ;;  %p2405_p5 = por %p2716_p1, %p49_p0 }
  0x54   : > { %2743 = sst [smem:[#allocation23_spill]] %s2401_s19  ;;  %p236_p9 = scmp.eq.s32.totalorder %s1490_s13, 1 }
  0x55   : > { %s2744_s20 = scalar_select %p2405_p5, 1, 0 }
  0x56   : > { %p1880_p4 = scmp.lt.s32.totalorder %s2225_s30, 2  ;;  %s2412_s14 = sand.u32 1, %s2221_s29  }
  0x57   : > { %p2414_p10 = por %p230_p7, %p43_p12  ;;  %p2418_p3 = por %p236_p9, %p49_p0 }
  0x58   : > { %p2422_p11 = pnand %p1880_p4, %p45_p2  ;;  %s332_s24 = sand.u32 1, %s2225_s30  }
  0x59   : > { %s2745_s22 = scalar_select %p2414_p10, 1, 0 }
  0x5a   : > { %s2746_s23 = scalar_select %p2418_p3, 1, 0 }
  0x5b   : > { %s2748_s10 = scalar_select %p2422_p11, 1, 0 }
  0x5c   : > { %2747 = sst [smem:[#allocation24_spill]] %s2746_s23  ;;  %s2713_s9 = sshll.u32 %s2412_s14, 3 }
  0x5d   : > { %s2714_s13 = sshll.u32 %s2225_s30, 7  ;;  %s336_s17 = scalar_lea.vmem [#allocation5], %s2713_s9 }
  0x5e   : > { %s343_s18 = sshll.u32 %s336_s17, 4  ;;  %s2749_s1 = sld [smem:[#allocation25_spill]]  ;;  %s2438_s18 = int_to_ptr.vmem [resolvable:$true] %s343_s18 }
  0x5f   : > { %s2440_s5 = scalar_lea.sflag [#allocation6], %s332_s24  ;;  %p2446_p13 = pneg %p2422_p11 }
  0x64   : > { %s2436_s3 = scalar_lea.hbm %s2749_s1, %s2714_s13  ;;  %s2006_s17 = scalar_lea.hbm %s2749_s1, 256 }
  0x65   : > { %s2001_s19 = scalar_lea.hbm %s2436_s3, 128  ;;  %p2007_p7 = scmp.lt.u32.totalorder %s2436_s3, %s2749_s1 }
  0x66   : > { %p2002_p12 = scmp.ne.s32.totalorder %s2436_s3, %s2001_s19  ;;  %p2008_p9 = scmp.lt.u32.totalorder %s2006_s17, %s2001_s19 }
  0x67   : > { %p2010_p1 = scmp.lt.u32.totalorder %s2001_s19, %s2436_s3 }
  0x68   : > { %p2004_p0 = pnand %p2446_p13, %p2002_p12  ;;  %p2009_p4 = por %p2008_p9, %p2007_p7 }
  0x6a   : > { %p2005_p2 = pneg %p2004_p0  ;;  %p2011_p3 = por %p2010_p1, %p2009_p4 }
  0x6c   : > { %p2012_p10 = pnand %p2011_p3, %p2005_p2 }
  0x6e   : > { %2015 = shalt.err (!%p2012_p10)
}
  0x6f   : > { %s2016_s24 = scalar_lea.vmem %s2438_s18, 128  ;;  %s2231_s25 = smov [#allocation5]  }
  0x70   : > { %p2017_p12 = scmp.ne.s32.totalorder %s2438_s18, %s2016_s24  ;;  %s2021_s26 = sshll.u32 %s2231_s25, 4  ;;  %s2022_s26 = int_to_ptr.vmem [resolvable:$false] %s2021_s26 }
  0x71   : > { %s2023_s29 = scalar_lea.vmem %s2022_s26, 256  ;;  %p2024_p6 = scmp.lt.s32.totalorder %s2438_s18, %s2022_s26 }
  0x72   : > { %p2019_p0 = pnand %p2017_p12, %p2446_p13  ;;  %p2025_p8 = scmp.lt.s32.totalorder %s2023_s29, %s2016_s24 }
  0x74   : > { %p2020_p5 = pneg %p2019_p0  ;;  %p2026_p7 = por %p2025_p8, %p2024_p6 }
  0x76   : > { %p2027_p9 = pnand %p2026_p7, %p2020_p5 }
  0x78   : > { %2030 = shalt.err (!%p2027_p9)
}
  0x79   : > { %1868 = dma.hbm_to_vmem [thread:$0]  (!%p2422_p11), %s2436_s3, 128, %s2438_s18, %s2440_s5  }
  0x7a   : > { %s2751_s19 = sshll.u32 %s2225_s30, 7  ;;  %s2232_s1 = smov [#allocation10]  }
  0x7b   : > { %s2475_s25 = scalar_lea.hbm %s2703_s2, %s2751_s19  ;;  %s268_s26 = sshll.u32 %s2232_s1, 4  ;;  %s269_s26 = int_to_ptr.vmem [resolvable:$true] %s268_s26 }
  0x7c   : > { %s2233_s24 = smov [#allocation13]   ;;  %s2031_s27 = scalar_lea.hbm %s2705_s4, 4096 }
  0x7d   : > { %s294_s29 = sshll.u32 %s2233_s24, 4  ;;  %p2032_p1 = scmp.ne.s32.totalorder %s2705_s4, %s2031_s27  ;;  %s2477_s29 = int_to_ptr.vmem [resolvable:$true] %s294_s29 }
  0x7e   : > { %p2752_p3 = scmp.ne.s32.totalorder %s2740_s21, 0  ;;  %p2038_p5 = scmp.lt.u32.totalorder %s2031_s27, %s2705_s4 }
  0x80   : > { %p2034_p6 = pnand %p2032_p1, %p2752_p3 }
  0x82   : > { %p2035_p8 = pneg %p2034_p6 }
  0x84   : > { %p2040_p10 = pnand %p2038_p5, %p2035_p8 }
  0x86   : > { %2043 = shalt.err (!%p2040_p10)
}
  0x87   : > { %s2044_s1 = scalar_lea.vmem %s269_s26, 4096  ;;  %p2052_p0 = scmp.lt.s32.totalorder %s269_s26, %s269_s26 }
  0x88   : > { %p2045_p2 = scmp.ne.s32.totalorder %s269_s26, %s2044_s1  ;;  %p2053_p7 = scmp.lt.s32.totalorder %s2044_s1, %s2044_s1 }
  0x8a   : > { %p2047_p4 = pnand %p2045_p2, %p2752_p3  ;;  %p2054_p9 = por %p2053_p7, %p2052_p0 }
  0x8c   : > { %p2048_p12 = pneg %p2047_p4 }
  0x8e   : > { %p2055_p11 = pnand %p2054_p9, %p2048_p12 }
  0x90   : > { %2058 = shalt.err (!%p2055_p11)
}
  0x91   : > { %p2753_p1 = scmp.ne.s32.totalorder %s2738_s15, 0  ;;  %s2754_s7 = smov 16  }
  0x92   : > { %s2755_s8 = smov 256   ;;  %s2059_s13 = scalar_lea.hbm %s2707_s6, 4096 }
  0x93   : > { %1855 = dma.hbm_to_vmem [thread:$0]  (!%p2753_p1), %s2705_s4, 4096, %s269_s26, [#allocation9], %s2755_s8, %s2755_s8, %s2754_s7  }
  0x94   : > { %p2060_p6 = scmp.ne.s32.totalorder %s2707_s6, %s2059_s13  ;;  %p2066_p5 = scmp.lt.u32.totalorder %s2059_s13, %s2707_s6 }
  0x96   : > { %p2062_p11 = pnand %p2060_p6, %p2752_p3 }
  0x98   : > { %p2063_p8 = pneg %p2062_p11 }
  0x9a   : > { %p2068_p10 = pnand %p2066_p5, %p2063_p8 }
  0x9c   : > { %2071 = shalt.err (!%p2068_p10)
}
  0x9d   : > { %s2072_s26 = scalar_lea.vmem %s2477_s29, 4096  ;;  %p2080_p0 = scmp.lt.s32.totalorder %s2477_s29, %s2477_s29 }
  0x9e   : > { %p2073_p2 = scmp.ne.s32.totalorder %s2477_s29, %s2072_s26  ;;  %p2081_p7 = scmp.lt.s32.totalorder %s2072_s26, %s2072_s26 }
  0xa0   : > { %p2075_p4 = pnand %p2073_p2, %p2752_p3  ;;  %p2082_p9 = por %p2081_p7, %p2080_p0 }
  0xa2   : > { %p2076_p12 = pneg %p2075_p4 }
  0xa4   : > { %p2083_p6 = pnand %p2082_p9, %p2076_p12 }
  0xa6   : > { %2086 = shalt.err (!%p2083_p6)
}
  0xa7   : > { %s2234_s1 = smov 128   ;;  %s2235_s7 = smov 8  }
  0xa8   : > { %1861 = dma.hbm_to_vmem [thread:$0]  (!%p2753_p1), %s2707_s6, 4096, %s2477_s29, [#allocation12], %s2234_s1, %s2234_s1, %s2235_s7  }
  0xa9   : > { %s1497_s16 = sshll.u32 %s2412_s14, 4  ;;  %s1523_s27 = sshll.u32 %s2225_s30, 8 }
  0xaa   : > { %s2531_s13 = scalar_lea.hbm %s2701_s0, %s1523_s27  ;;  %s315_s17 = scalar_lea.vmem [#allocation2], %s1497_s16 }
  0xab   : > { %s322_s15 = sshll.u32 %s315_s17, 4  ;;  %s2756_s24 = sshll.u32 %s2412_s14, 3  ;;  %s2533_s15 = int_to_ptr.vmem [resolvable:$true] %s322_s15 }
  0xac   : > { %s2537_s3 = scalar_lea.vmem [#allocation7], %s2756_s24  ;;  %s312_s18 = scalar_lea.sflag [#allocation3], %s2412_s14 }
  0xad   : > { %s361_s29 = sshll.u32 %s2537_s3, 4  ;;  %s2087_s26 = scalar_lea.hbm %s2531_s13, 256  ;;  %s362_s29 = int_to_ptr.vmem [resolvable:$true] %s361_s29 }
  0xae   : > { %p2088_p3 = scmp.ne.s32.totalorder %s2531_s13, %s2087_s26  ;;  %s2092_s27 = scalar_lea.hbm %s2701_s0, 512 }
  0xaf   : > { %p2093_p8 = scmp.lt.u32.totalorder %s2531_s13, %s2701_s0  ;;  %p2094_p5 = scmp.lt.u32.totalorder %s2092_s27, %s2087_s26 }
  0xb0   : > { %p2090_p1 = pnand %p2088_p3, %p2446_p13  ;;  %p2096_p2 = scmp.lt.u32.totalorder %s2087_s26, %s2531_s13 }
  0xb1   : > { %p2095_p10 = por %p2094_p5, %p2093_p8 }
  0xb2   : > { %p2091_p11 = pneg %p2090_p1 }
  0xb3   : > { %p2097_p4 = por %p2096_p2, %p2095_p10 }
  0xb5   : > { %p2098_p12 = pnand %p2097_p4, %p2091_p11 }
  0xb7   : > { %2101 = shalt.err (!%p2098_p12)
}
  0xb8   : > { %s2102_s19 = scalar_lea.vmem %s2533_s15, 256  ;;  %s2236_s17 = smov [#allocation2]  }
  0xb9   : > { %p2103_p0 = scmp.ne.s32.totalorder %s2533_s15, %s2102_s19  ;;  %s2107_s24 = sshll.u32 %s2236_s17, 4  ;;  %s2108_s24 = int_to_ptr.vmem [resolvable:$false] %s2107_s24 }
  0xba   : > { %s2109_s21 = scalar_lea.vmem %s2108_s24, 512  ;;  %p2110_p6 = scmp.lt.s32.totalorder %s2533_s15, %s2108_s24 }
  0xbb   : > { %p2105_p7 = pnand %p2103_p0, %p2446_p13  ;;  %p2111_p3 = scmp.lt.s32.totalorder %s2109_s21, %s2102_s19 }
  0xbd   : > { %p2106_p9 = pneg %p2105_p7  ;;  %p2112_p1 = por %p2111_p3, %p2110_p6 }
  0xbf   : > { %p2113_p8 = pnand %p2112_p1, %p2106_p9 }
  0xc1   : > { %2116 = shalt.err (!%p2113_p8)
}
  0xc2   : > { %p2757_p11 = scmp.ne.s32.totalorder %s2748_s10, 0  ;;  %s2117_s26 = scalar_lea.hbm %s2475_s25, 128 }
  0xc3   : > { %p2118_p5 = scmp.ne.s32.totalorder %s2475_s25, %s2117_s26  ;;  %s2122_s14 = scalar_lea.hbm %s2703_s2, 256 }
  0xc4   : > { %1865 = dma.hbm_to_vmem [thread:$0]  (!%p2757_p11), %s2531_s13, 256, %s2533_s15, %s312_s18, %s2234_s1, %s2234_s1, %s2235_s7  }
  0xc5   : > { %p2120_p10 = pnand %p2118_p5, %p2446_p13  ;;  %p2123_p4 = scmp.lt.u32.totalorder %s2475_s25, %s2703_s2 }
  0xc6   : > { %p2124_p12 = scmp.lt.u32.totalorder %s2122_s14, %s2117_s26  ;;  %p2126_p7 = scmp.lt.u32.totalorder %s2117_s26, %s2475_s25 }
  0xc7   : > { %p2121_p2 = pneg %p2120_p10 }
  0xc8   : > { %p2125_p0 = por %p2124_p12, %p2123_p4 }
  0xca   : > { %p2127_p9 = por %p2126_p7, %p2125_p0 }
  0xcc   : > { %p2128_p6 = pnand %p2127_p9, %p2121_p2 }
  0xce   : > { %2131 = shalt.err (!%p2128_p6)
}
  0xcf   : > { %s2132_s1 = scalar_lea.vmem %s362_s29, 128  ;;  %s2237_s7 = smov [#allocation7]  }
  0xd0   : > { %p2133_p3 = scmp.ne.s32.totalorder %s362_s29, %s2132_s1  ;;  %s2137_s13 = sshll.u32 %s2237_s7, 4  ;;  %s2138_s13 = int_to_ptr.vmem [resolvable:$false] %s2137_s13 }
  0xd1   : > { %s2139_s15 = scalar_lea.vmem %s2138_s13, 256  ;;  %p2140_p5 = scmp.lt.s32.totalorder %s362_s29, %s2138_s13 }
  0xd2   : > { %p2135_p1 = pnand %p2133_p3, %p2446_p13  ;;  %p2141_p10 = scmp.lt.s32.totalorder %s2139_s15, %s2132_s1 }
  0xd4   : > { %p2136_p8 = pneg %p2135_p1  ;;  %p2142_p11 = por %p2141_p10, %p2140_p5 }
  0xd6   : > { %p2143_p4 = pnand %p2142_p11, %p2136_p8 }
  0xd8   : > { %2146 = shalt.err (!%p2143_p4)
}
  0xd9   : > { %p2758_p12 = scmp.ne.s32.totalorder %s2748_s10, 0  ;;  %p2759_p2 = scmp.ne.s32.totalorder %s2737_s12, 0 }
  0xda   : > { %s2590_s9 = sand.u32 (!%p2759_p2), 1, %s2217_s28   ;;  %p2760_p13 = scmp.ne.s32.totalorder (!%p2759_p2), %s2744_s20, 0 }
  0xdb   : > { %1871 = dma.hbm_to_vmem [thread:$0]  (!%p2758_p12), %s2475_s25, 128, %s362_s29, %s2440_s5  }
  0xdc   : > { %370 = sbr.rel (%p2759_p2) target bundleno = 1753 (0x6d9), region = 52  ;;  %s1505_s3 = sshll.u32 (!%p2759_p2), %s2590_s9, 4 }
  0xdd   : > { %s373_s18 = scalar_lea.sflag (!%p2759_p2), [#allocation3], %s2590_s9  ;;  %s2596_s19 = scalar_lea.vmem (!%p2759_p2), [#allocation2], %s1505_s3 }
  0xe3   : > { %2192 = dma.done.wait (%p2760_p13), %s373_s18, 256  }
  0xe4   : > { %2194 = vsyncadd (%p2760_p13), %s373_s18, 4294967040  ;;  %s381_s5 = sand.u32 1, %s2308_s11   ;;  %s1506_s12 = sshll.u32 %s2590_s9, 3 }
  0xe5   : > { %s382_s10 = scalar_lea.sflag [#allocation6], %s381_s5  ;;  %s2604_s25 = scalar_lea.vmem [#allocation5], %s1506_s12 }
  0xe6   : > { %2196 = dma.done.wait (%p2760_p13), %s382_s10, 256  }
  0xe7   : > { %2198 = vsyncadd (%p2760_p13), %s382_s10, 4294967040  ;;  %s2610_s29 = scalar_lea.vmem [#allocation7], %s1506_s12  ;;  %p2761_p11 = scmp.eq.s32.totalorder %s2308_s11, 0 }
  0xe9   : > { %2200 = dma.done.wait (%p2761_p11), [#allocation9], 8192   ;;  %p2762_p0 = pmov %p2761_p11 }
  0xeb   : > { %2202 = vsyncadd (%p2762_p0), [#allocation9], 4294959104  ;;  %p2763_p7 = pmov %p2762_p0 }
  0xec   : > { %p2764_p9 = pmov %p2762_p0 }
  0xed   : > { %2204 = dma.done.wait (%p2763_p7), [#allocation12], 8192  }
  0xee   : > { %2206 = vsyncadd (%p2764_p9), [#allocation12], 4294959104  ;;  %v2238_v0 = vmov 0.0   ;;  %v458_v1 = vld [vmem:[#allocation8 + $0x8] sm:$0xff]  ;;  %v460_v2 = vld [vmem:[#allocation8 + $0x18] sm:$0xff]  ;;  %vm847_vm0 = vcmask 64512  }
  0xef   : > { %553 = vmatprep.mubr.f32.mxu0 %v2238_v0  ;;  %v457_v3 = vld [vmem:[#allocation8] sm:$0xff]  ;;  %v1663_v4 = vpack.c.bf16 %v460_v2, %v458_v1  ;;  %v459_v5 = vld [vmem:[#allocation8 + $0x10] sm:$0xff]  ;;  %v462_v6 = vld [vmem:[#allocation8 + $0x28] sm:$0xff]  ;;  %s452_s20 = scalar_lea.vmem [#allocation14], %s1505_s3  ;;  %s2765_s26 = sld [smem:[#allocation28_spill]] }
  0xf0   : > { %v464_v7 = vld [vmem:[#allocation8 + $0x38] sm:$0xff]  ;;  %v1665_v8 = vpack.c.bf16 %v459_v5, %v457_v3  ;;  %v461_v10 = vld [vmem:[#allocation8 + $0x20] sm:$0xff]  ;;  %v463_v11 = vld [vmem:[#allocation8 + $0x30] sm:$0xff]  ;;  %s1336_s17 = sshll.u32 %s452_s20, 4  ;;  %s1524_s8 = sshll.u32 %s2308_s11, 8  ;;  %s2652_s17 = int_to_ptr.vmem [resolvable:$true] %s1336_s17 }
  0xf1   : > { %v1667_v9 = vpack.c.bf16 %v464_v7, %v462_v6  ;;  %v466_v12 = vld [vmem:[#allocation8 + $0x48] sm:$0xff]  ;;  %1664 = vmatprep.subr.bf16.mxu0 %v1663_v4  ;;  %v468_v13 = vld [vmem:[#allocation8 + $0x58] sm:$0xff]  ;;  %v1669_v14 = vpack.c.bf16 %v463_v11, %v461_v10  ;;  %v465_v16 = vld [vmem:[#allocation8 + $0x40] sm:$0xff]  ;;  %s2766_s23 = sld [smem:[#allocation29_spill]]  ;;  %s1323_s1 = scalar_lea.sflag [#allocation4], %s2590_s9 }
  0xf2   : > { %1666 = vmatpush1.bf16.msra.mxu0 %v1665_v8  ;;  %v1671_v15 = vpack.c.bf16 %v468_v13, %v466_v12  ;;  %v467_v17 = vld [vmem:[#allocation8 + $0x50] sm:$0xff]  ;;  %v470_v18 = vld [vmem:[#allocation8 + $0x68] sm:$0xff]  ;;  %v472_v19 = vld [vmem:[#allocation8 + $0x78] sm:$0xff]  ;;  %s2147_s7 = scalar_lea.vmem %s2652_s17, 256  ;;  %p2767_p3 = scmp.ne.s32.totalorder %s2745_s22, 0 }
  0xf3   : > { %1668 = vmatprep.subr.bf16.mxu0 %v1667_v9  ;;  %v1673_v20 = vpack.c.bf16 %v467_v17, %v465_v16  ;;  %v1675_v21 = vpack.c.bf16 %v472_v19, %v470_v18  ;;  %v469_v22 = vld [vmem:[#allocation8 + $0x60] sm:$0xff]  ;;  %v471_v23 = vld [vmem:[#allocation8 + $0x70] sm:$0xff]  ;;  %v474_v24 = vld [vmem:[#allocation8 + $0x88] sm:$0xff]  ;;  %p2148_p6 = scmp.ne.s32.totalorder %s2652_s17, %s2147_s7  ;;  %s2239_s11 = smov [#allocation14]  }
  0xf4   : > { %v476_v25 = vld [vmem:[#allocation8 + $0x98] sm:$0xff]  ;;  %v1677_v26 = vpack.c.bf16 %v471_v23, %v469_v22  ;;  %v473_v28 = vld [vmem:[#allocation8 + $0x80] sm:$0xff]  ;;  %v475_v29 = vld [vmem:[#allocation8 + $0x90] sm:$0xff]  ;;  %s2151_s13 = sshll.u32 %s2239_s11, 4  ;;  %s2152_s13 = int_to_ptr.vmem [resolvable:$false] %s2151_s13 }
  0xf5   : > { %v1679_v27 = vpack.c.bf16 %v476_v25, %v474_v24  ;;  %v478_v30 = vld [vmem:[#allocation8 + $0xa8] sm:$0xff]  ;;  %v480_v31 = vld [vmem:[#allocation8 + $0xb8] sm:$0xff]  ;;  %v1681_v32 = vpack.c.bf16 %v475_v29, %v473_v28  ;;  %v477_v34 = vld [vmem:[#allocation8 + $0xa0] sm:$0xff]  ;;  %p2149_p1 = pnand %p2148_p6, %p2767_p3  ;;  %s2153_s15 = scalar_lea.vmem %s2152_s13, 512 }
  0xf6   : > { %1670 = vmatpush1.bf16.msra.mxu0 %v1669_v14  ;;  %v1683_v33 = vpack.c.bf16 %v480_v31, %v478_v30  ;;  %v479_v35 = vld [vmem:[#allocation8 + $0xb0] sm:$0xff]  ;;  %v482_v36 = vld [vmem:[#allocation8 + $0xc8] sm:$0xff]  ;;  %v484_v37 = vld [vmem:[#allocation8 + $0xd8] sm:$0xff]  ;;  %p2154_p5 = scmp.lt.s32.totalorder %s2652_s17, %s2152_s13  ;;  %p2155_p10 = scmp.lt.s32.totalorder %s2153_s15, %s2147_s7 }
  0xf7   : > { %1672 = vmatprep.subr.bf16.mxu0 %v1671_v15  ;;  %v1685_v38 = vpack.c.bf16 %v479_v35, %v477_v34  ;;  %v1687_v39 = vpack.c.bf16 %v484_v37, %v482_v36  ;;  %v481_v40 = vld [vmem:[#allocation8 + $0xc0] sm:$0xff]  ;;  %v483_v41 = vld [vmem:[#allocation8 + $0xd0] sm:$0xff]  ;;  %v486_v42 = vld [vmem:[#allocation8 + $0xe8] sm:$0xff]  ;;  %s2657_s16 = scalar_lea.hbm %s2766_s23, %s1524_s8  ;;  %p2150_p8 = pneg %p2149_p1 }
  0xf8   : > { %v488_v43 = vld [vmem:[#allocation8 + $0xf8] sm:$0xff]  ;;  %v1689_v44 = vpack.c.bf16 %v483_v41, %v481_v40  ;;  %v485_v46 = vld [vmem:[#allocation8 + $0xe0] sm:$0xff]  ;;  %v487_v47 = vld [vmem:[#allocation8 + $0xf0] sm:$0xff]  ;;  %p2156_p4 = por %p2155_p10, %p2154_p5 }
  0xf9   : > { %v1691_v45 = vpack.c.bf16 %v488_v43, %v486_v42  ;;  %v567_v48 = vld [vmem:[#allocation10 + $0x8] sm:$0xff]  ;;  %v569_v49 = vld [vmem:[#allocation10 + $0x18] sm:$0xff]  ;;  %v1693_v50 = vpack.c.bf16 %v487_v47, %v485_v46  ;;  %v566_v52 = vld [vmem:[#allocation10] sm:$0xff] }
  0xfa   : > { %1674 = vmatpush1.bf16.msra.mxu0 %v1673_v20  ;;  %v1695_v51 = vpack.c.bf16 %v569_v49, %v567_v48  ;;  %v568_v53 = vld [vmem:[#allocation10 + $0x10] sm:$0xff]  ;;  %v571_v54 = vld [vmem:[#allocation10 + $0x28] sm:$0xff]  ;;  %v573_v55 = vld [vmem:[#allocation10 + $0x38] sm:$0xff]  ;;  %p2157_p12 = pnand %p2156_p4, %p2150_p8 }
  0xfb   : > { %1676 = vmatprep.subr.bf16.mxu0 %v1675_v21  ;;  %v453_v56 = vld [vmem:[%s2596_s19] sm:$0xff]  ;;  %v1697_v57 = vpack.c.bf16 %v568_v53, %v566_v52  ;;  %v1699_v58 = vpack.c.bf16 %v573_v55, %v571_v54  ;;  %v575_v61 = vld [vmem:[#allocation10 + $0x48] sm:$0xff]  ;;  %v577_v62 = vld [vmem:[#allocation10 + $0x58] sm:$0xff] }
  0xfc   : > { %v570_v59 = vld [vmem:[#allocation10 + $0x20] sm:$0xff]  ;;  %v572_v60 = vld [vmem:[#allocation10 + $0x30] sm:$0xff]  ;;  %v454_v1 = vld [vmem:[%s2596_s19 + $0x8] sm:$0xff]  ;;  %v1703_v2 = vpack.c.bf16 %v577_v62, %v575_v61 }
  0xfd   : > { %v1701_v63 = vpack.c.bf16 %v572_v60, %v570_v59  ;;  %v574_v3 = vld [vmem:[#allocation10 + $0x40] sm:$0xff]  ;;  %v576_v4 = vld [vmem:[#allocation10 + $0x50] sm:$0xff]  ;;  %v579_v5 = vld [vmem:[#allocation10 + $0x68] sm:$0xff] }
  0xfe   : > { %1678 = vmatpush1.bf16.msra.mxu0 %v1677_v26  ;;  %v581_v6 = vld [vmem:[#allocation10 + $0x78] sm:$0xff]  ;;  %v1705_v7 = vpack.c.bf16 %v576_v4, %v574_v3  ;;  %v578_v9 = vld [vmem:[#allocation10 + $0x60] sm:$0xff]  ;;  %v580_v10 = vld [vmem:[#allocation10 + $0x70] sm:$0xff] }
  0xff   : > { %1680 = vmatprep.subr.bf16.mxu0 %v1679_v27  ;;  %v1707_v8 = vpack.c.bf16 %v581_v6, %v579_v5  ;;  %v583_v11 = vld [vmem:[#allocation10 + $0x88] sm:$0xff]  ;;  %v585_v12 = vld [vmem:[#allocation10 + $0x98] sm:$0xff]  ;;  %v1709_v13 = vpack.c.bf16 %v580_v10, %v578_v9  ;;  %v582_v15 = vld [vmem:[#allocation10 + $0x80] sm:$0xff] }
 0x100   : > { %v1711_v14 = vpack.c.bf16 %v585_v12, %v583_v11  ;;  %v584_v16 = vld [vmem:[#allocation10 + $0x90] sm:$0xff]  ;;  %v587_v17 = vld [vmem:[#allocation10 + $0xa8] sm:$0xff]  ;;  %v589_v18 = vld [vmem:[#allocation10 + $0xb8] sm:$0xff] }
 0x101   : > { %v1713_v19 = vpack.c.bf16 %v584_v16, %v582_v15  ;;  %v1715_v20 = vpack.c.bf16 %v589_v18, %v587_v17  ;;  %v586_v21 = vld [vmem:[#allocation10 + $0xa0] sm:$0xff]  ;;  %v588_v22 = vld [vmem:[#allocation10 + $0xb0] sm:$0xff]  ;;  %v591_v23 = vld [vmem:[#allocation10 + $0xc8] sm:$0xff] }
 0x102   : > { %1682 = vmatpush1.bf16.msra.mxu0 %v1681_v32  ;;  %v593_v24 = vld [vmem:[#allocation10 + $0xd8] sm:$0xff]  ;;  %v1717_v25 = vpack.c.bf16 %v588_v22, %v586_v21  ;;  %v590_v27 = vld [vmem:[#allocation10 + $0xc0] sm:$0xff]  ;;  %v592_v28 = vld [vmem:[#allocation10 + $0xd0] sm:$0xff] }
 0x103   : > { %1684 = vmatprep.subr.bf16.mxu0 %v1683_v33  ;;  %v1719_v26 = vpack.c.bf16 %v593_v24, %v591_v23  ;;  %v595_v29 = vld [vmem:[#allocation10 + $0xe8] sm:$0xff]  ;;  %v597_v30 = vld [vmem:[#allocation10 + $0xf8] sm:$0xff]  ;;  %v1721_v31 = vpack.c.bf16 %v592_v28, %v590_v27  ;;  %v594_v33 = vld [vmem:[#allocation10 + $0xe0] sm:$0xff] }
 0x104   : > { %v1723_v32 = vpack.c.bf16 %v597_v30, %v595_v29  ;;  %v596_v34 = vld [vmem:[#allocation10 + $0xf0] sm:$0xff]  ;;  %v670_v35 = vld [vmem:[#allocation11 + $0x8] sm:$0xff]  ;;  %v672_v36 = vld [vmem:[#allocation11 + $0x18] sm:$0xff] }
 0x105   : > { %v1725_v37 = vpack.c.bf16 %v596_v34, %v594_v33  ;;  %v671_v40 = vld [vmem:[#allocation11 + $0x10] sm:$0xff]  ;;  %v674_v41 = vld [vmem:[#allocation11 + $0x28] sm:$0xff]  ;;  %v676_v42 = vld [vmem:[#allocation11 + $0x38] sm:$0xff] }
 0x106   : > { %1686 = vmatpush1.bf16.msra.mxu0 %v1685_v38  ;;  %v1727_v38 = vpack.c.bf16 %v672_v36, %v670_v35  ;;  %v455_v43 = vld [vmem:[%s2604_s25] sm:$0xff]  ;;  %v675_v47 = vld [vmem:[#allocation11 + $0x30] sm:$0xff]  ;;  %v680_v49 = vld [vmem:[#allocation11 + $0x58] sm:$0xff] }
 0x107   : > { %1688 = vmatprep.subr.bf16.mxu0 %v1687_v39  ;;  %v669_v39 = vld [vmem:[#allocation11] sm:$0xff]  ;;  %v678_v48 = vld [vmem:[#allocation11 + $0x48] sm:$0xff]  ;;  %v679_v53 = vld [vmem:[#allocation11 + $0x50] sm:$0xff] }
 0x108   : > { %v673_v46 = vld [vmem:[#allocation11 + $0x20] sm:$0xff]  ;;  %v682_v54 = vld [vmem:[#allocation11 + $0x68] sm:$0xff]  ;;  %v684_v55 = vld [vmem:[#allocation11 + $0x78] sm:$0xff] }
 0x109   : > { %v677_v52 = vld [vmem:[#allocation11 + $0x40] sm:$0xff]  ;;  %v683_v59 = vld [vmem:[#allocation11 + $0x70] sm:$0xff]  ;;  %v686_v60 = vld [vmem:[#allocation11 + $0x88] sm:$0xff] }
 0x10a   : > { %1690 = vmatpush1.bf16.msra.mxu0 %v1689_v44  ;;  %v1729_v44 = vpack.c.bf16 %v671_v40, %v669_v39  ;;  %v688_v61 = vld [vmem:[#allocation11 + $0x98] sm:$0xff]  ;;  %v689_v6 = vld [vmem:[#allocation11 + $0xa0] sm:$0xff] }
 0x10b   : > { %1692 = vmatprep.subr.bf16.mxu0 %v1691_v45  ;;  %v1731_v45 = vpack.c.bf16 %v676_v42, %v674_v41  ;;  %v692_v3 = vld [vmem:[#allocation11 + $0xb8] sm:$0xff]  ;;  %v693_v12 = vld [vmem:[#allocation11 + $0xc0] sm:$0xff] }
 0x10c   : > { %v696_v9 = vld [vmem:[#allocation11 + $0xd8] sm:$0xff]  ;;  %v697_v18 = vld [vmem:[#allocation11 + $0xe0] sm:$0xff] }
 0x10d   : > { %v700_v15 = vld [vmem:[#allocation11 + $0xf8] sm:$0xff] }
 0x10e   : > { %1694 = vmatpush1.bf16.msra.mxu0 %v1693_v50  ;;  %v1733_v50 = vpack.c.bf16 %v675_v47, %v673_v46  ;;  %v456_v21 = vld [vmem:[%s2610_s29] sm:$0xff] }
 0x10f   : > { %1696 = vmatprep.subr.bf16.mxu0 %v1695_v51  ;;  %v1735_v51 = vpack.c.bf16 %v680_v49, %v678_v48 }
 0x111   : > { %554 = vmatmul.mubr.f32.vlgmr.msra.gmra.mrb[0].mxu0 %v453_v56  ;;  %v1737_v56 = vpack.c.bf16 %v679_v53, %v677_v52 }
 0x112   : > { %1698 = vmatpush1.bf16.msra.mxu0 %v1697_v57  ;;  %559 = vmatprep.mubr.f32.mxu0 %v2238_v0  ;;  %v1739_v57 = vpack.c.bf16 %v684_v55, %v682_v54 }
 0x113   : > { %1700 = vmatprep.subr.bf16.mxu0 %v1699_v58  ;;  %v681_v58 = vld [vmem:[#allocation11 + $0x60] sm:$0xff] }
 0x114   : > { %v1741_v62 = vpack.c.bf16 %v683_v59, %v681_v58 }
 0x115   : > { %560 = vmatmul.mubr.f32.gmra.mrb[2].mxu0 %v454_v1  ;;  %v685_v1 = vld [vmem:[#allocation11 + $0x80] sm:$0xff] }
 0x116   : > { %1702 = vmatpush1.bf16.msra.mxu0 %v1701_v63  ;;  %662 = vmatprep.mubr.f32.mxu0 %v2238_v0  ;;  %v1743_v63 = vpack.c.bf16 %v688_v61, %v686_v60  ;;  %v1145_v60 = vld [vmem:[#allocation13 + $0x80] sm:$0xff]  ;;  %v1146_v61 = vld [vmem:[#allocation13 + $0x88] sm:$0xff] }
 0x117   : > { %1704 = vmatprep.subr.bf16.mxu0 %v1703_v2  ;;  %v690_v2 = vld [vmem:[#allocation11 + $0xa8] sm:$0xff] }
 0x118   : > { %v1747_v5 = vpack.c.bf16 %v692_v3, %v690_v2  ;;  %v1149_v2 = vld [vmem:[#allocation13 + $0xa0] sm:$0xff]  ;;  %v1150_v3 = vld [vmem:[#allocation13 + $0xa8] sm:$0xff] }
 0x11a   : > { %1706 = vmatpush1.bf16.msra.mxu0 %v1705_v7  ;;  %v691_v7 = vld [vmem:[#allocation11 + $0xb0] sm:$0xff] }
 0x11b   : > { %1708 = vmatprep.subr.bf16.mxu0 %v1707_v8  ;;  %v694_v8 = vld [vmem:[#allocation11 + $0xc8] sm:$0xff]  ;;  %v1749_v10 = vpack.c.bf16 %v691_v7, %v689_v6  ;;  %v1152_v6 = vld [vmem:[#allocation13 + $0xb8] sm:$0xff] }
 0x11c   : > { %v1751_v11 = vpack.c.bf16 %v696_v9, %v694_v8  ;;  %v1153_v8 = vld [vmem:[#allocation13 + $0xc0] sm:$0xff]  ;;  %v1154_v9 = vld [vmem:[#allocation13 + $0xc8] sm:$0xff] }
 0x11e   : > { %1710 = vmatpush1.bf16.msra.mxu0 %v1709_v13  ;;  %v695_v13 = vld [vmem:[#allocation11 + $0xd0] sm:$0xff] }
 0x11f   : > { %1712 = vmatprep.subr.bf16.mxu0 %v1711_v14  ;;  %v698_v14 = vld [vmem:[#allocation11 + $0xe8] sm:$0xff]  ;;  %v1753_v16 = vpack.c.bf16 %v695_v13, %v693_v12  ;;  %v1156_v12 = vld [vmem:[#allocation13 + $0xd8] sm:$0xff] }
 0x120   : > { %v1755_v17 = vpack.c.bf16 %v700_v15, %v698_v14  ;;  %v1157_v14 = vld [vmem:[#allocation13 + $0xe0] sm:$0xff]  ;;  %v1158_v15 = vld [vmem:[#allocation13 + $0xe8] sm:$0xff] }
 0x122   : > { %1714 = vmatpush1.bf16.msra.mxu0 %v1713_v19  ;;  %v699_v19 = vld [vmem:[#allocation11 + $0xf0] sm:$0xff] }
 0x123   : > { %1716 = vmatprep.subr.bf16.mxu0 %v1715_v20  ;;  %v1757_v20 = vpack.c.bf16 %v699_v19, %v697_v18  ;;  %v1160_v18 = vld [vmem:[#allocation13 + $0xf8] sm:$0xff] }
 0x126   : > { %1718 = vmatpush1.bf16.msra.mxu0 %v1717_v25 }
 0x127   : > { %1720 = vmatprep.subr.bf16.mxu0 %v1719_v26 }
 0x12a   : > { %1722 = vmatpush1.bf16.msra.mxu0 %v1721_v31 }
 0x12b   : > { %1724 = vmatprep.subr.bf16.mxu0 %v1723_v32 }
 0x12e   : > { %1726 = vmatpush1.bf16.msra.mxu0 %v1725_v37 }
 0x12f   : > { %1728 = vmatprep.subr.bf16.mxu0 %v1727_v38 }
 0x131   : > { %663 = vmatmul.mubr.f32.vlgmr.msra.gmra.mrb[4].mxu0 %v455_v43 }
 0x132   : > { %1730 = vmatpush1.bf16.msra.mxu0 %v1729_v44  ;;  %765 = vmatprep.mubr.f32.mxu0 %v2238_v0  ;;  %v687_v0 = vld [vmem:[#allocation11 + $0x90] sm:$0xff] }
 0x133   : > { %1732 = vmatprep.subr.bf16.mxu0 %v1731_v45  ;;  %v1745_v4 = vpack.c.bf16 %v687_v0, %v685_v1  ;;  %v1148_v1 = vld [vmem:[#allocation13 + $0x98] sm:$0xff] }
 0x136   : > { %1734 = vmatpush1.bf16.msra.mxu0 %v1733_v50 }
 0x137   : > { %1736 = vmatprep.subr.bf16.mxu0 %v1735_v51 }
 0x13a   : > { %1738 = vmatpush1.bf16.msra.mxu0 %v1737_v56 }
 0x13b   : > { %1740 = vmatprep.subr.bf16.mxu0 %v1739_v57 }
 0x13e   : > { %1742 = vmatpush1.bf16.msra.mxu0 %v1741_v62  ;;  %v1147_v62 = vld [vmem:[#allocation13 + $0x90] sm:$0xff] }
 0x13f   : > { %1744 = vmatprep.subr.bf16.mxu0 %v1743_v63  ;;  %v1759_v63 = vpack.c.bf16 %v1146_v61, %v1145_v60  ;;  %v1763_v0 = vpack.c.bf16 %v1148_v1, %v1147_v62 }
 0x142   : > { %1746 = vmatpush1.bf16.msra.mxu0 %v1745_v4  ;;  %v1767_v4 = vpack.c.bf16 %v1150_v3, %v1149_v2 }
 0x143   : > { %1748 = vmatprep.subr.bf16.mxu0 %v1747_v5  ;;  %v1151_v5 = vld [vmem:[#allocation13 + $0xb0] sm:$0xff] }
 0x144   : > { %v1771_v7 = vpack.c.bf16 %v1152_v6, %v1151_v5 }
 0x146   : > { %1750 = vmatpush1.bf16.msra.mxu0 %v1749_v10  ;;  %v1775_v10 = vpack.c.bf16 %v1154_v9, %v1153_v8 }
 0x147   : > { %1752 = vmatprep.subr.bf16.mxu0 %v1751_v11  ;;  %v1155_v11 = vld [vmem:[#allocation13 + $0xd0] sm:$0xff] }
 0x148   : > { %v1779_v13 = vpack.c.bf16 %v1156_v12, %v1155_v11 }
 0x14a   : > { %1754 = vmatpush1.bf16.msra.mxu0 %v1753_v16  ;;  %v1783_v16 = vpack.c.bf16 %v1158_v15, %v1157_v14 }
 0x14b   : > { %1756 = vmatprep.subr.bf16.mxu0 %v1755_v17  ;;  %v1159_v17 = vld [vmem:[#allocation13 + $0xf0] sm:$0xff] }
 0x14c   : > { %v1787_v19 = vpack.c.bf16 %v1160_v18, %v1159_v17 }
 0x14e   : > { %1758 = vmatpush1.bf16.msra.mxu0 %v1757_v20  ;;  %v951_v20 = vld [vmem:[#allocation13] sm:$0xff] }
 0x151   : > { %766 = vmatmul.mubr.f32.vlgmr.msra.gmra.mrb[6].mxu0 %v456_v21  ;;  %v952_v21 = vld [vmem:[#allocation13 + $0x8] sm:$0xff] }
 0x1e4   : > { %v555_v22 = vpop.f32.mrb[0].mxu0 }
 0x1e5   : > { %v557_v23 = vpop.f32.mrb[1].mxu0  ;;  %1575 = vmatprep.mubr.f32.mxu1 %v555_v22  ;;  %v1791_v22 = vpack.c.bf16 %v952_v21, %v951_v20 }
 0x1e8   : > { %v561_v24 = vpop.f32.mrb[2].mxu0 }
 0x1e9   : > { %v563_v25 = vpop.f32.mrb[3].mxu0 }
 0x204   : > { %v664_v26 = vpop.f32.mrb[4].mxu0 }
 0x205   : > { %v666_v27 = vpop.f32.mrb[5].mxu0  ;;  %1573 = vmatprep.subr.mxu1 %v664_v26 }
 0x206   : > { %1574 = vmatpush3.xpose.msra.mxu1 %v664_v26 }
 0x209   : > { %1576 = vmatmul.mubr.f32.vlgmr.msra.gmra.mrb[0].mxu1 %v561_v24 }
 0x224   : > { %v767_v28 = vpop.f32.mrb[6].mxu0 }
 0x225   : > { %1578 = vmatprep.subr.mxu1 %v767_v28  ;;  %v769_v33 = vpop.f32.mrb[7].mxu0 }
 0x226   : > { %1579 = vmatpush3.msra.mxu1 %v767_v28  ;;  %v953_v28 = vld [vmem:[#allocation13 + $0x10] sm:$0xff] }
 0x227   : > { %1583 = vmatprep.subr.mxu1 %v666_v27 }
 0x2dc   : > { %v1577_v29 = vpop.f32.mrb[0].mxu1 }
 0x2dd   : > { %v838_v30 = vpop.f32.mrb[1].mxu1  ;;  %v851_v32 = vsel %vm847_vm0, %v1577_v29, -inf }
 0x2de   : > { %v848_v31 = vsel %vm847_vm0, %v838_v30, -inf }
 0x2df   : > { %849 = vmax.xlane.f32.xlu0 %v848_v31 }
 0x2e3   : > { %852 = vmax.xlane.f32.xlu0 %v851_v32 }
 0x36c   : > { %v850_v34 = vpop.xlane.xlu0 %849 }
 0x36d   : > { %v854_v35 = vsub.f32 %v838_v30, %v850_v34 }
 0x36f   : > { %v856_v36 = vmul.f32 1.442695, %v854_v35 }
 0x370   : > { %v853_v37 = vpop.xlane.xlu0 %852 }
 0x371   : > { %1929 = vpow2.f32 %v856_v36  ;;  %v855_v38 = vsub.f32 %v1577_v29, %v853_v37  ;;  %v954_v29 = vld [vmem:[#allocation13 + $0x18] sm:$0xff]  ;;  %v955_v37 = vld [vmem:[#allocation13 + $0x20] sm:$0xff] }
 0x372   : > { %v1795_v35 = vpack.c.bf16 %v954_v29, %v953_v28 }
 0x373   : > { %v858_v39 = vmul.f32 1.442695, %v855_v38  ;;  %v956_v38 = vld [vmem:[#allocation13 + $0x28] sm:$0xff] }
 0x375   : > { %1931 = vpow2.f32 %v858_v39  ;;  %v1799_v39 = vpack.c.bf16 %v956_v38, %v955_v37 }
 0x37b   : > { %v1930_v40 = vpop.eup %1929 }
 0x37c   : > { %1580 = vmatprep.mubr.msk.f32.mxu1 %vm847_vm0, %v1930_v40  ;;  %v860_v57 = vsel %vm847_vm0, %v1930_v40, 0.0  ;;  %v957_v40 = vld [vmem:[#allocation13 + $0x30] sm:$0xff] }
 0x37f   : > { %v1932_v41 = vpop.eup %1931 }
 0x380   : > { %1581 = vmatmul.mubr.msk.f32.vlgmr.msra.gmra.mrb[2].mxu1 %vm847_vm0, %v1932_v41  ;;  %v863_v59 = vsel %vm847_vm0, %v1932_v41, 0.0  ;;  %v958_v41 = vld [vmem:[#allocation13 + $0x38] sm:$0xff] }
 0x381   : > { %1584 = vmatpush3.xpose.msra.mxu1 %v666_v27  ;;  %1585 = vmatprep.mubr.f32.mxu1 %v557_v23 }
 0x382   : > { %1588 = vmatprep.subr.mxu1 %v769_v33 }
 0x384   : > { %1586 = vmatmul.mubr.f32.vlgmr.msra.gmra.mrb[4].mxu1 %v563_v25 }
 0x385   : > { %1589 = vmatpush3.msra.mxu1 %v769_v33 }
 0x386   : > { %1760 = vmatprep.subr.bf16.mxu1 %v1759_v63 }
 0x453   : > { %v2632_v42 = vpop.f32.mrb[2].mxu1 }
 0x454   : > { %v2634_v43 = vpop.f32.mrb[3].mxu1 }
 0x457   : > { %v1587_v44 = vpop.f32.mrb[4].mxu1 }
 0x458   : > { %v1033_v45 = vpop.f32.mrb[5].mxu1  ;;  %v1045_v47 = vsel %vm847_vm0, %v1587_v44, -inf }
 0x459   : > { %v1042_v46 = vsel %vm847_vm0, %v1033_v45, -inf }
 0x45a   : > { %1043 = vmax.xlane.f32.xlu1 %v1042_v46  ;;  %v960_v46 = vld [vmem:[#allocation13 + $0x48] sm:$0xff] }
 0x45e   : > { %1046 = vmax.xlane.f32.xlu1 %v1045_v47 }
 0x4e7   : > { %v1044_v48 = vpop.xlane.xlu1 %1043 }
 0x4e8   : > { %v1048_v49 = vsub.f32 %v1033_v45, %v1044_v48  ;;  %v959_v45 = vld [vmem:[#allocation13 + $0x40] sm:$0xff]  ;;  %v961_v48 = vld [vmem:[#allocation13 + $0x50] sm:$0xff] }
 0x4e9   : > { %v1807_v47 = vpack.c.bf16 %v960_v46, %v959_v45 }
 0x4ea   : > { %v1050_v50 = vmul.f32 1.442695, %v1048_v49  ;;  %v962_v49 = vld [vmem:[#allocation13 + $0x58] sm:$0xff] }
 0x4eb   : > { %v1047_v51 = vpop.xlane.xlu1 %1046 }
 0x4ec   : > { %1933 = vpow2.f32 %v1050_v50  ;;  %v1049_v52 = vsub.f32 %v1587_v44, %v1047_v51  ;;  %v1803_v44 = vpack.c.bf16 %v958_v41, %v957_v40  ;;  %v1811_v50 = vpack.c.bf16 %v962_v49, %v961_v48  ;;  %v963_v51 = vld [vmem:[#allocation13 + $0x60] sm:$0xff] }
 0x4ee   : > { %v1052_v53 = vmul.f32 1.442695, %v1049_v52  ;;  %v964_v52 = vld [vmem:[#allocation13 + $0x68] sm:$0xff] }
 0x4f0   : > { %1935 = vpow2.f32 %v1052_v53  ;;  %v1815_v53 = vpack.c.bf16 %v964_v52, %v963_v51 }
 0x4f6   : > { %v1934_v54 = vpop.eup %1933 }
 0x4f7   : > { %1590 = vmatprep.mubr.msk.f32.mxu1 %vm847_vm0, %v1934_v54  ;;  %v1054_v55 = vsel %vm847_vm0, %v1934_v54, 0.0  ;;  %v965_v54 = vld [vmem:[#allocation13 + $0x70] sm:$0xff] }
 0x4f8   : > { %1055 = vadd.xlane.f32.xlu0 %v1054_v55  ;;  %v966_v55 = vld [vmem:[#allocation13 + $0x78] sm:$0xff] }
 0x4fa   : > { %v1936_v56 = vpop.eup %1935 }
 0x4fb   : > { %1591 = vmatmul.mubr.msk.f32.vlgmr.msra.gmra.mrb[6].mxu1 %vm847_vm0, %v1936_v56  ;;  %v1057_v58 = vsel %vm847_vm0, %v1936_v56, 0.0  ;;  %v1819_v56 = vpack.c.bf16 %v966_v55, %v965_v54 }
 0x4fc   : > { %861 = vadd.xlane.f32.xlu0 %v860_v57  ;;  %1058 = vadd.xlane.f32.xlu1 %v1057_v58 }
 0x4fd   : > { %1762 = vmatpush3.bf16.msra.mxu1 %v1759_v63 }
 0x4fe   : > { %1764 = vmatprep.subr.bf16.mxu1 %v1763_v0 }
 0x500   : > { %864 = vadd.xlane.f32.xlu1 %v863_v59  ;;  %v1517_v59 = vld [vmem:[%s2765_s26] ss:$0 sm:$0xff] }
 0x501   : > { %1766 = vmatpush3.bf16.msra.mxu1 %v1763_v0 }
 0x502   : > { %1768 = vmatprep.subr.bf16.mxu1 %v1767_v4 }
 0x505   : > { %1770 = vmatpush3.bf16.msra.mxu1 %v1767_v4 }
 0x506   : > { %1772 = vmatprep.subr.bf16.mxu1 %v1771_v7 }
 0x509   : > { %1774 = vmatpush3.bf16.msra.mxu1 %v1771_v7 }
 0x50a   : > { %1776 = vmatprep.subr.bf16.mxu1 %v1775_v10 }
 0x50d   : > { %1778 = vmatpush3.bf16.msra.mxu1 %v1775_v10 }
 0x50e   : > { %1780 = vmatprep.subr.bf16.mxu1 %v1779_v13 }
 0x511   : > { %1782 = vmatpush3.bf16.msra.mxu1 %v1779_v13 }
 0x512   : > { %1784 = vmatprep.subr.bf16.mxu1 %v1783_v16 }
 0x515   : > { %1786 = vmatpush3.bf16.msra.mxu1 %v1783_v16 }
 0x516   : > { %1788 = vmatprep.subr.bf16.mxu1 %v1787_v19 }
 0x519   : > { %1790 = vmatpush3.bf16.msra.mxu1 %v1787_v19 }
 0x51a   : > { %1792 = vmatprep.subr.bf16.mxu1 %v1791_v22 }
 0x585   : > { %v1056_v23 = vpop.xlane.xlu0 %1055 }
 0x586   : > { %1937 = vrcp.f32 %v1056_v23 }
 0x589   : > { %v862_v24 = vpop.xlane.xlu0 %861  ;;  %v1059_v25 = vpop.xlane.xlu1 %1058 }
 0x58a   : > { %1939 = vrcp.f32 %v862_v24 }
 0x58b   : > { %1941 = vrcp.f32 %v1059_v25 }
 0x590   : > { %v1938_v26 = vpop.eup %1937 }
 0x594   : > { %v1940_v30 = vpop.eup %1939 }
 0x595   : > { %v1942_v32 = vpop.eup %1941  ;;  %v949_v36 = vmul.f32 %v1940_v30, %v2634_v43  ;;  %v865_v43 = vpop.xlane.xlu1 %864 }
 0x596   : > { %1943 = vrcp.f32 %v865_v43 }
 0x5a0   : > { %v1944_v57 = vpop.eup %1943 }
 0x5a1   : > { %v950_v58 = vmul.f32 %v1944_v57, %v2632_v42 }
 0x5ce   : > { %v1592_v27 = vpop.f32.mrb[6].mxu1 }
 0x5cf   : > { %v1132_v31 = vpop.f32.mrb[7].mxu1  ;;  %v1144_v34 = vmul.f32 %v1942_v32, %v1592_v27 }
 0x5d0   : > { %v1143_v33 = vmul.f32 %v1938_v26, %v1132_v31 }
 0x5d2   : > { %1625 = vmatprep.mubr.f32.mxu1 %v1143_v33 }
 0x5d3   : > { %1626 = vmatmul.mubr.f32.vlgmr.msra.gmra.mrb[8].mxu1 %v1144_v34 }
 0x5d4   : > { %1794 = vmatpush3.bf16.msra.mxu1 %v1791_v22  ;;  %1660 = vmatprep.mubr.f32.mxu1 %v949_v36 }
 0x5d5   : > { %1796 = vmatprep.subr.bf16.mxu1 %v1795_v35 }
 0x5d8   : > { %1798 = vmatpush3.bf16.msra.mxu1 %v1795_v35 }
 0x5d9   : > { %1800 = vmatprep.subr.bf16.mxu1 %v1799_v39 }
 0x5dc   : > { %1802 = vmatpush3.bf16.msra.mxu1 %v1799_v39 }
 0x5dd   : > { %1804 = vmatprep.subr.bf16.mxu1 %v1803_v44 }
 0x5e0   : > { %1806 = vmatpush3.bf16.msra.mxu1 %v1803_v44 }
 0x5e1   : > { %1808 = vmatprep.subr.bf16.mxu1 %v1807_v47 }
 0x5e4   : > { %1810 = vmatpush3.bf16.msra.mxu1 %v1807_v47 }
 0x5e5   : > { %1812 = vmatprep.subr.bf16.mxu1 %v1811_v50 }
 0x5e8   : > { %1814 = vmatpush3.bf16.msra.mxu1 %v1811_v50 }
 0x5e9   : > { %1816 = vmatprep.subr.bf16.mxu1 %v1815_v53 }
 0x5ec   : > { %1818 = vmatpush3.bf16.msra.mxu1 %v1815_v53 }
 0x5ed   : > { %1820 = vmatprep.subr.bf16.mxu1 %v1819_v56 }
 0x5f0   : > { %1822 = vmatpush3.bf16.msra.mxu1 %v1819_v56 }
 0x5f3   : > { %1661 = vmatmul.mubr.f32.vlgmr.msra.gmra.mrb[8].mxu1 %v950_v58 }
 0x6c6   : > { %v1662_v60 = vpop.f32.mrb[8].mxu1 }
 0x6c7   : > { %v1319_v61 = vadd.f32 %v1662_v60, %v1517_v59  ;;  %v1302_v62 = vpop.f32.mrb[9].mxu1 }
 0x6c8   : > { %v1318_v42 = vadd.f32 %v1517_v59, %v1302_v62 }
 0x6c9   : > { %1321 = vst [vmem:[%s452_s20 + $0x8] sm:$0xff] %v1319_v61 }
 0x6ca   : > { %1320 = vst [vmem:[%s452_s20] sm:$0xff] %v1318_v42 }
 0x6cb   : > { %2160 = shalt.err (!%p2157_p12)
}
 0x6cc   : > { %s2161_s3 = scalar_lea.hbm %s2657_s16, 256  ;;  %s2165_s5 = scalar_lea.hbm %s2766_s23, 512 }
 0x6cd   : > { %p2162_p2 = scmp.ne.s32.totalorder %s2657_s16, %s2161_s3  ;;  %p2166_p0 = scmp.lt.u32.totalorder %s2657_s16, %s2766_s23 }
 0x6ce   : > { %p2167_p7 = scmp.lt.u32.totalorder %s2165_s5, %s2161_s3  ;;  %p2169_p6 = scmp.lt.u32.totalorder %s2161_s3, %s2657_s16 }
 0x6cf   : > { %p2163_p13 = pnand %p2162_p2, %p2767_p3 }
 0x6d0   : > { %p2168_p9 = por %p2167_p7, %p2166_p0 }
 0x6d1   : > { %p2164_p11 = pneg %p2163_p13 }
 0x6d2   : > { %p2170_p1 = por %p2169_p6, %p2168_p9 }
 0x6d4   : > { %p2171_p8 = pnand %p2170_p1, %p2164_p11 }
 0x6d6   : > { %2174 = shalt.err (!%p2171_p8)
}
 0x6d7   : > { %s2240_s25 = smov 128   ;;  %s2241_s29 = smov 8  }
 0x6d8   : > { %1847 = dma.vmem_to_hbm [thread:$0]  (%p2767_p3), %s2652_s17, 256, %s2657_s16, %s1323_s1, %s2240_s25, %s2240_s25, %s2241_s29  }
 0x6d9 PF: > { %s2768_s20 = sld [smem:[#allocation20_spill]]  ;;  %s2769_s24 = sld [smem:[#allocation24_spill]] }
 0x6da   : > { %p2771_p10 = scmp.ge.s32.totalorder %s2225_s30, 2 }
 0x6df   : > { %s1351_s21 = sand.u32 1, %s2768_s20   ;;  %p2770_p5 = scmp.ne.s32.totalorder %s2769_s24, 0 }
 0x6e0   : > { %s1352_s26 = scalar_lea.sflag [#allocation4], %s1351_s21 }
 0x6e1   : > { %p1873_p4 = pnand %p2771_p10, %p2770_p5 }
 0x6e3   : > { %2208 = dma.done.wait (!%p1873_p4), %s1352_s26, 256  }
 0x6e4   : > { %2210 = vsyncadd (!%p1873_p4), %s1352_s26, 4294967040  ;;  %s2772_s30 = sld [smem:[#allocation22_spill]]  ;;  %s2773_s8 = sld [smem:[#allocation21_spill]] }
 0x6e5   : > { %s2774_s29 = sld [smem:[#allocation23_spill]]  ;;  %s2775_s27 = smov %s2217_s28 }
 0x6ea   : > { %p26_p12 = scmp.ge.s32.totalorder %s2772_s30, 4   ;;  %s2776_s28 = smov %s2773_s8 }
 0x6ec   :  { %28 = sbr.rel (!%p26_p12) target bundleno = 15 (0xf), region = 137 }
 0x6f3   :  { %1357 = vsyncpa [#allocation3], 1 }
 0x6f4   :  { %1359 = vsyncpa [#allocation3 + $0x1], 1 }
 0x6f5   :  { %1360 = vsyncpa [#allocation6], 1 }
 0x6f6   :  { %1362 = vsyncpa [#allocation6 + $0x1], 1 }
 0x6f7   :  { %1363 = vsyncpa [#allocation9], 1 }
 0x6f8   :  { %1364 = vsyncpa [#allocation12], 1 }
 0x6f9   :  { %1365 = vsyncpa [#allocation4], 1 }
 0x6fa   :  { %1367 = vsyncpa [#allocation4 + $0x1], 1 }

</bundles_post_ra>
